<compile_context>
chip_gen: v6e
topology: v6e:2x2x1
jax: 0.10.0
libtpu: 0.0.40
codegen_flags: <defaults>
</compile_context>

<pallas_src>
import functools

import jax
import jax.numpy as jnp
from jax.experimental import pallas as pl
from jax.experimental.pallas import tpu as pltpu

# Module hyper-parameters (defaults of JMMDLoss.__init__), baked in statically.
KERNEL_MUL = (2.0, 2.0)
KERNEL_NUM = (5, 1)
FIX_SIGMA = (None, 1.68)
# TODO(synk): mmd_type='jmmd_linear' branch not implemented (default forward
# path is mmd_type='jmmd').

_LANE = 128
_SUBLANE = 8
_VMEM_SOFT_BUDGET = 48 * 1024 * 1024   # leave headroom under v7x's 64 MiB


def _round_up(x, m):
    return -(-x // m) * m


def _multi_gaussian(l2, scale, kernel_mul, kernel_num):
    """sum_i exp(-l2 / (bw_base * mul^i)) with scale = -1/(bw_base*mul^(num-1)).

    For mul == 2 the bandwidths are powers of two apart, so ONE EUP exp plus
    repeated VPU squaring produces all terms (VPU has slack under the MXU/EUP
    work).
    """
    e = jnp.exp(l2 * scale)            # widest-bandwidth term (i = num-1)
    if kernel_num == 1:
        return e
    if kernel_mul == 2.0:
        acc = e
        t = e
        for _ in range(kernel_num - 1):
            t = t * t                  # next narrower bandwidth
            acc = acc + t
        return acc
    # Generic fallback: one exp per bandwidth, scalar-scaled.
    acc = e
    for i in range(1, kernel_num):
        acc = acc + jnp.exp(l2 * (scale * (kernel_mul ** i)))
    return acc


def _jmmd_kernel(imap_ref, jmap_ref, scales_ref, raux_ref, caux_ref,
                 f0r_ref, f1r_ref, f0c_ref, f1c_ref, out_ref):
    t = pl.program_id(0)
    i = imap_ref[t]                    # row-stripe index of this tile
    j = jmap_ref[t]                    # column-stripe index (j >= i)

    # Gram matrices on the MXU: rows are (tile, D); columns were pre-transposed
    # once in the wrapper to (D, tile) so this is a canonical (M,K)x(K,N)
    # matmul with no per-tile transpose / layout copy.
    gram0 = jnp.dot(f0r_ref[...], f0c_ref[...], preferred_element_type=jnp.float32)
    gram1 = jnp.dot(f1r_ref[...], f1c_ref[...], preferred_element_type=jnp.float32)

    # ||r - c||^2 = ||r||^2 + ||c||^2 - 2<r,c> with precomputed f32 norms.
    # maximum(.,0) only clamps Gram-trick round-off.
    l2_0 = jnp.maximum(raux_ref[:, 0:1] + caux_ref[0:1, :] - 2.0 * gram0, 0.0)
    l2_1 = jnp.maximum(raux_ref[:, 1:2] + caux_ref[1:2, :] - 2.0 * gram1, 0.0)

    k0 = _multi_gaussian(l2_0, scales_ref[0], KERNEL_MUL[0], KERNEL_NUM[0])
    k1 = _multi_gaussian(l2_1, scales_ref[1], KERNEL_MUL[1], KERNEL_NUM[1])

    # Signed / masked joint kernel: per-row weight +1 (src), -1 (tar), 0 (pad).
    kw = (k0 * k1) * raux_ref[:, 2:3] * caux_ref[2:3, :]

    # VPU-only tree reduce (tile, tile) -> one (8, 128) block: sum aligned
    # sub-blocks (no XLU cross-lane reduce, no SMEM scalar RMW).  The final
    # reduce over (n_i*8, 128) happens in the wrapper.
    tm, tn = kw.shape
    acc8 = kw[0:_SUBLANE, :]
    for a in range(1, tm // _SUBLANE):
        acc8 = acc8 + kw[a * _SUBLANE:(a + 1) * _SUBLANE, :]
    part = acc8[:, 0:_LANE]
    for c in range(1, tn // _LANE):
        part = part + acc8[:, c * _LANE:(c + 1) * _LANE]

    # Triangular schedule: an off-diagonal tile stands for (i,j) AND (j,i).
    factor = jnp.where(i == j, jnp.float32(1.0), jnp.float32(2.0))

    @pl.when(j == i)                   # first tile of row stripe i
    def _():
        out_ref[...] = jnp.zeros_like(out_ref)

    out_ref[...] = out_ref[...] + factor * part


def _layer_scale(total_f32, kernel_mul, kernel_num, fix_sigma):
    """-1 / widest_bandwidth following PyTorch's bandwidth rules."""
    if fix_sigma:   # torch truthiness: fix_sigma=0.0 falls back to data-driven
        bw = jnp.float32(fix_sigma)
    else:
        n = total_f32.shape[0]
        # sum_{a,b}||x_a-x_b||^2 == 2 n sum_a ||x_a - mean||^2  (centered form:
        # single pass AND numerically stable — no catastrophic cancellation).
        c = total_f32 - jnp.mean(total_f32, axis=0, keepdims=True)
        sum_l2 = 2.0 * jnp.float32(n) * jnp.sum(c * c)
        bw = sum_l2 / jnp.float32(n * n - n)
        bw = jnp.maximum(bw, jnp.float32(1e-12))   # degenerate all-equal batch
    bw = bw / (kernel_mul ** (kernel_num // 2))
    return (-1.0 / (bw * (kernel_mul ** (kernel_num - 1)))).astype(jnp.float32)


def _vmem_estimate(tile, feat_row_bytes):
    feat = 2 * 2 * tile * feat_row_bytes       # (row + col^T specs) x 2 buffers
    inter = 10 * tile * tile * 4               # f32 (tile,tile) temporaries
    return feat + inter + (2 << 20)


def _choose_tile(n, feat_row_bytes):
    """Tiles are always >= 128 and a multiple of 128; N <= 512 runs as a
    single resident block (one grid step)."""
    n128 = _round_up(n, _LANE)
    cands = []
    if n128 <= 512:
        cands.append(n128)                     # whole problem in one block
    if _round_up(n, 256) == _round_up(n, 128) or n >= 4096:
        cands += [256, 128]                    # 256 feeds v6e/v7x MXU full-width
    else:
        cands += [128, 256]                    # avoid large padding waste
    for t in cands:
        if _vmem_estimate(t, feat_row_bytes) <= _VMEM_SOFT_BUDGET:
            return t, _round_up(n, t)
    # TODO(synk): gigantic feature dims would need K-splitting; fall back to
    # the smallest tile with a raised VMEM limit.
    return 128, _round_up(n, 128)


@functools.partial(jax.jit, static_argnames=("use_bf16_gram",))
def jmmd_loss(src0, tar0, src1, tar1, use_bf16_gram=False):
    """JMMDLoss(mmd_type='jmmd').forward([src0, src1], [tar0, tar1])."""
    b = src0.shape[0]
    n = 2 * b

    tot0 = jnp.concatenate([src0, tar0], axis=0).astype(jnp.float32)
    tot1 = jnp.concatenate([src1, tar1], axis=0).astype(jnp.float32)

    # Per-layer scale = -1 / widest bandwidth (f32, exact, computed once).
    scales = jnp.stack([
        _layer_scale(tot0, KERNEL_MUL[0], KERNEL_NUM[0], FIX_SIGMA[0]),
        _layer_scale(tot1, KERNEL_MUL[1], KERNEL_NUM[1], FIX_SIGMA[1]),
    ])                                                       # (2,) f32 -> SMEM

    # Row norms (computed ONCE, f32) + quadrant / padding weights.
    sq0 = jnp.sum(tot0 * tot0, axis=1)
    sq1 = jnp.sum(tot1 * tot1, axis=1)
    w = jnp.concatenate([jnp.ones((b,), jnp.float32),
                         -jnp.ones((b,), jnp.float32)])

    # bf16 Gram operands: default only when the inputs already are bf16;
    # opt-in for f32 inputs (2-4x MXU throughput on v5e/v6e/v7x, ~1e-3-level
    # relative perturbation of kernel values; norms + bandwidth stay f32).
    gram_dtype = jnp.bfloat16 if (use_bf16_gram or src0.dtype == jnp.bfloat16
                                  or src1.dtype == jnp.bfloat16) else jnp.float32
    isz = jnp.dtype(gram_dtype).itemsize

    d0p = _round_up(src0.shape[1], _LANE)
    d1p = _round_up(src1.shape[1], _LANE)
    tile, n_pad = _choose_tile(n, (d0p + d1p) * isz)
    n_i = n_pad // tile

    def _pad_feat(x, dp):
        # Zero lane/row padding does not change L2 distances; padded rows get
        # weight 0 so they never contribute to the loss.
        return jnp.pad(x.astype(gram_dtype),
                       ((0, n_pad - n), (0, dp - x.shape[1])))

    f0 = _pad_feat(tot0, d0p)                   # (n_pad, d0p) rows
    f1 = _pad_feat(tot1, d1p)
    f0t = f0.T                                  # (d0p, n_pad) cols, transposed once
    f1t = f1.T

    row_aux = jnp.pad(jnp.stack([sq0, sq1, w], axis=1),
                      ((0, n_pad - n), (0, 0)))              # (n_pad, 3)
    col_aux = row_aux.T                                      # (3, n_pad)

    # Triangular tile schedule (i <= j): halves flops/exps/col DMA traffic.
    pairs = [(i, j) for i in range(n_i) for j in range(i, n_i)]
    imap = jnp.asarray([p[0] for p in pairs], dtype=jnp.int32)
    jmap = jnp.asarray([p[1] for p in pairs], dtype=jnp.int32)
    n_steps = len(pairs)

    est = _vmem_estimate(tile, (d0p + d1p) * isz)
    vmem_limit = int(min(max(est, 32 * 1024 * 1024), 64 * 1024 * 1024))

    cost = pl.CostEstimate(
        flops=int(n_steps * tile * tile * (2 * (d0p + d1p) + 16)),
        transcendentals=int(2 * n_steps * tile * tile),   # 1 exp/layer/pair
        bytes_accessed=int((n_i + n_steps) * tile * (d0p + d1p) * isz
                           + n_steps * tile * 6 * 4
                           + n_i * _SUBLANE * _LANE * 4),
    )

    grid_spec = pltpu.PrefetchScalarGridSpec(
        num_scalar_prefetch=2,            # imap, jmap -> SMEM, seen by index_maps
        grid=(n_steps,),
        in_specs=[
            pl.BlockSpec(memory_space=pltpu.MemorySpace.SMEM),          # scales
            pl.BlockSpec((tile, 3), lambda t, im, jm: (im[t], 0)),      # row aux
            pl.BlockSpec((3, tile), lambda t, im, jm: (0, jm[t])),      # col aux
            pl.BlockSpec((tile, d0p), lambda t, im, jm: (im[t], 0)),    # f0 rows
            pl.BlockSpec((tile, d1p), lambda t, im, jm: (im[t], 0)),    # f1 rows
            pl.BlockSpec((d0p, tile), lambda t, im, jm: (0, jm[t])),    # f0^T cols
            pl.BlockSpec((d1p, tile), lambda t, im, jm: (0, jm[t])),    # f1^T cols
        ],
        out_specs=pl.BlockSpec((_SUBLANE, _LANE), lambda t, im, jm: (im[t], 0)),
    )

    partials = pl.pallas_call(
        _jmmd_kernel,
        grid_spec=grid_spec,
        out_shape=jax.ShapeDtypeStruct((n_i * _SUBLANE, _LANE), jnp.float32),
        compiler_params=pltpu.CompilerParams(
            # 1-D triangular grid accumulates per row stripe -> "arbitrary".
            # TODO(synk): on v7x megacore the row stripes could additionally be
            # split across the two TensorCores via core_map.
            dimension_semantics=("arbitrary",),
            vmem_limit_bytes=vmem_limit,
        ),
        cost_estimate=cost,
    )(imap, jmap, scales, row_aux, col_aux, f0, f1, f0t, f1t)

    return jnp.sum(partials) / jnp.float32(b * b)


# ------------------------- pure-JAX reference -------------------------------
def _ref_gaussian(src, tar, kernel_mul, kernel_num, fix_sigma):
    n_samples = src.shape[0] + tar.shape[0]
    total = jnp.concatenate([src, tar], axis=0).astype(jnp.float32)
    diff = total[None, :, :] - total[:, None, :]
    l2 = jnp.sum(diff * diff, axis=2)
    if fix_sigma:
        bandwidth = jnp.float32(fix_sigma)
    else:
        bandwidth = jnp.sum(l2) / (n_samples ** 2 - n_samples)
    bandwidth = bandwidth / (kernel_mul ** (kernel_num // 2))
    return sum(jnp.exp(-l2 / (bandwidth * kernel_mul ** i)) for i in range(kernel_num))


def ref_jmmd(src_list, tar_list):
    joint = None
    for i in range(len(src_list)):
        k = _ref_gaussian(src_list[i], tar_list[i],
                          KERNEL_MUL[i], KERNEL_NUM[i], FIX_SIGMA[i])
        joint = k if joint is None else joint * k
    b = src_list[0].shape[0]
    xx = joint[:b, :b]
    yy = joint[b:, b:]
    xy = joint[:b, b:]
    yx = joint[b:, :b]
    return jnp.mean(xx + yy - xy - yx)


if __name__ == "__main__":
    key = jax.random.PRNGKey(0)

    def make(bsz, d0, d1, ks):
        k0, k1, k2, k3 = jax.random.split(ks, 4)
        return (jax.random.normal(k0, (bsz, d0), jnp.float32),
                jax.random.normal(k1, (bsz, d0), jnp.float32) + 0.5,
                jax.random.normal(k2, (bsz, d1), jnp.float32),
                jax.random.normal(k3, (bsz, d1), jnp.float32) + 0.25)

    kA, kB, kC = jax.random.split(key, 3)

    # Case 1: typical small config (single resident 128x128 block).
    s0, t0, s1, t1 = make(8, 32, 8, kA)
    loss = jax.block_until_ready(jmmd_loss(s0, t0, s1, t1))
    ref = ref_jmmd([s0, s1], [t0, t1])
    assert jnp.allclose(loss, ref, rtol=1e-3, atol=1e-3), (loss, ref)

    # Case 2: batch not a multiple of 8 (exercises zero-weight row padding).
    s0, t0, s1, t1 = make(5, 40, 3, kB)
    loss = jax.block_until_ready(jmmd_loss(s0, t0, s1, t1))
    ref = ref_jmmd([s0, s1], [t0, t1])
    assert jnp.allclose(loss, ref, rtol=1e-3, atol=1e-3), (loss, ref)

    # Case 3: multi-tile triangular grid (N=640 -> 5 stripes, 15 tiles) with a
    # src/tar boundary inside a tile (handled by the +/-1 weight vectors).
    s0, t0, s1, t1 = make(320, 16, 4, kC)
    loss = jax.block_until_ready(jmmd_loss(s0, t0, s1, t1))
    ref = ref_jmmd([s0, s1], [t0, t1])
    assert jnp.allclose(loss, ref, rtol=1e-3, atol=1e-3), (loss, ref)

    # Case 4: opt-in bf16 Gram operands (f32 norms/bandwidth, looser tolerance).
    s0, t0, s1, t1 = make(8, 32, 8, kA)
    loss_bf16 = jax.block_until_ready(jmmd_loss(s0, t0, s1, t1, use_bf16_gram=True))
    ref = ref_jmmd([s0, s1], [t0, t1])
    assert jnp.allclose(loss_bf16, ref, rtol=5e-2, atol=5e-2), (loss_bf16, ref)

    print("KERNEL_OK")
</pallas_src>

<mosaic_0001>
module attributes {stable_mosaic.version = 11 : i64} {
  func.func @_jmmd_kernel(%arg0: i32, %arg1: memref<1xi32, #tpu.memory_space<smem>>, %arg2: memref<1xi32, #tpu.memory_space<smem>>, %arg3: memref<2xf32, #tpu.memory_space<smem>>, %arg4: memref<128x3xf32, #tpu.memory_space<vmem>>, %arg5: memref<3x128xf32, #tpu.memory_space<vmem>>, %arg6: memref<128x128xf32, #tpu.memory_space<vmem>>, %arg7: memref<128x128xf32, #tpu.memory_space<vmem>>, %arg8: memref<128x128xf32, #tpu.memory_space<vmem>>, %arg9: memref<128x128xf32, #tpu.memory_space<vmem>>, %arg10: memref<8x128xf32, #tpu.memory_space<vmem>>) attributes {dimension_semantics = [#tpu.dimension_semantics<arbitrary>], iteration_bounds = array<i64: 1>, scalar_prefetch = 2 : i64, scratch_operands = 0 : i64, tpu.core_type = #tpu.core_type<tc>, window_params = [{transform_indices = @transform_0, window_bounds = array<i64: 2>}, {transform_indices = @transform_1, window_bounds = array<i64: 128, 3>}, {transform_indices = @transform_2, window_bounds = array<i64: 3, 128>}, {transform_indices = @transform_3, window_bounds = array<i64: 128, 128>}, {transform_indices = @transform_4, window_bounds = array<i64: 128, 128>}, {transform_indices = @transform_5, window_bounds = array<i64: 128, 128>}, {transform_indices = @transform_6, window_bounds = array<i64: 128, 128>}, {transform_indices = @transform_7, window_bounds = array<i64: 8, 128>}]} {
    %0 = arith.index_cast %arg0 : i32 to index
    %1 = memref.load %arg1[%0] : memref<1xi32, #tpu.memory_space<smem>>
    %2 = arith.index_cast %arg0 : i32 to index
    %3 = memref.load %arg2[%2] : memref<1xi32, #tpu.memory_space<smem>>
    %c0 = arith.constant 0 : index
    %c0_0 = arith.constant 0 : index
    %4 = vector.load %arg6[%c0, %c0_0] : memref<128x128xf32, #tpu.memory_space<vmem>>, vector<128x128xf32>
    %c0_1 = arith.constant 0 : index
    %c0_2 = arith.constant 0 : index
    %5 = vector.load %arg8[%c0_1, %c0_2] : memref<128x128xf32, #tpu.memory_space<vmem>>, vector<128x128xf32>
    %cst = arith.constant dense<0.000000e+00> : vector<128x128xf32>
    %6 = tpu.matmul %4, %5, %cst {dimension_numbers = #tpu.dot_dimension_numbers<[1], [0], [0], [1], [0, 0, 1, 1], [], []>} : vector<128x128xf32>, vector<128x128xf32>, vector<128x128xf32> -> vector<128x128xf32>
    %c0_3 = arith.constant 0 : index
    %c0_4 = arith.constant 0 : index
    %7 = vector.load %arg7[%c0_3, %c0_4] : memref<128x128xf32, #tpu.memory_space<vmem>>, vector<128x128xf32>
    %c0_5 = arith.constant 0 : index
    %c0_6 = arith.constant 0 : index
    %8 = vector.load %arg9[%c0_5, %c0_6] : memref<128x128xf32, #tpu.memory_space<vmem>>, vector<128x128xf32>
    %cst_7 = arith.constant dense<0.000000e+00> : vector<128x128xf32>
    %9 = tpu.matmul %7, %8, %cst_7 {dimension_numbers = #tpu.dot_dimension_numbers<[1], [0], [0], [1], [0, 0, 1, 1], [], []>} : vector<128x128xf32>, vector<128x128xf32>, vector<128x128xf32> -> vector<128x128xf32>
    %c0_8 = arith.constant 0 : index
    %c0_9 = arith.constant 0 : index
    %10 = vector.load %arg4[%c0_8, %c0_9] : memref<128x3xf32, #tpu.memory_space<vmem>>, vector<128x1xf32>
    %c0_10 = arith.constant 0 : index
    %c0_11 = arith.constant 0 : index
    %11 = vector.load %arg5[%c0_10, %c0_11] : memref<3x128xf32, #tpu.memory_space<vmem>>, vector<1x128xf32>
    %12 = vector.broadcast %10 : vector<128x1xf32> to vector<128x128xf32>
    %13 = vector.broadcast %11 : vector<1x128xf32> to vector<128x128xf32>
    %14 = arith.addf %12, %13 : vector<128x128xf32>
    %cst_12 = arith.constant 2.000000e+00 : f32
    %15 = vector.broadcast %cst_12 : f32 to vector<128x128xf32>
    %16 = arith.mulf %15, %6 : vector<128x128xf32>
    %17 = arith.subf %14, %16 : vector<128x128xf32>
    %cst_13 = arith.constant 0.000000e+00 : f32
    %18 = vector.broadcast %cst_13 : f32 to vector<128x128xf32>
    %19 = arith.maximumf %17, %18 : vector<128x128xf32>
    %c0_14 = arith.constant 0 : index
    %c1 = arith.constant 1 : index
    %20 = vector.load %arg4[%c0_14, %c1] : memref<128x3xf32, #tpu.memory_space<vmem>>, vector<128x1xf32>
    %c1_15 = arith.constant 1 : index
    %c0_16 = arith.constant 0 : index
    %21 = vector.load %arg5[%c1_15, %c0_16] : memref<3x128xf32, #tpu.memory_space<vmem>>, vector<1x128xf32>
    %22 = vector.broadcast %20 : vector<128x1xf32> to vector<128x128xf32>
    %23 = vector.broadcast %21 : vector<1x128xf32> to vector<128x128xf32>
    %24 = arith.addf %22, %23 : vector<128x128xf32>
    %cst_17 = arith.constant 2.000000e+00 : f32
    %25 = vector.broadcast %cst_17 : f32 to vector<128x128xf32>
    %26 = arith.mulf %25, %9 : vector<128x128xf32>
    %27 = arith.subf %24, %26 : vector<128x128xf32>
    %cst_18 = arith.constant 0.000000e+00 : f32
    %28 = vector.broadcast %cst_18 : f32 to vector<128x128xf32>
    %29 = arith.maximumf %27, %28 : vector<128x128xf32>
    %c0_19 = arith.constant 0 : index
    %30 = memref.load %arg3[%c0_19] : memref<2xf32, #tpu.memory_space<smem>>
    %31 = vector.broadcast %30 : f32 to vector<128x128xf32>
    %32 = arith.mulf %19, %31 : vector<128x128xf32>
    %33 = math.exp %32 : vector<128x128xf32>
    %34 = arith.mulf %33, %33 : vector<128x128xf32>
    %35 = arith.addf %33, %34 : vector<128x128xf32>
    %36 = arith.mulf %34, %34 : vector<128x128xf32>
    %37 = arith.addf %35, %36 : vector<128x128xf32>
    %38 = arith.mulf %36, %36 : vector<128x128xf32>
    %39 = arith.addf %37, %38 : vector<128x128xf32>
    %40 = arith.mulf %38, %38 : vector<128x128xf32>
    %41 = arith.addf %39, %40 : vector<128x128xf32>
    %c1_20 = arith.constant 1 : index
    %42 = memref.load %arg3[%c1_20] : memref<2xf32, #tpu.memory_space<smem>>
    %43 = vector.broadcast %42 : f32 to vector<128x128xf32>
    %44 = arith.mulf %29, %43 : vector<128x128xf32>
    %45 = math.exp %44 : vector<128x128xf32>
    %46 = arith.mulf %41, %45 : vector<128x128xf32>
    %c0_21 = arith.constant 0 : index
    %c2 = arith.constant 2 : index
    %47 = vector.load %arg4[%c0_21, %c2] : memref<128x3xf32, #tpu.memory_space<vmem>>, vector<128x1xf32>
    %48 = vector.broadcast %47 : vector<128x1xf32> to vector<128x128xf32>
    %49 = arith.mulf %46, %48 : vector<128x128xf32>
    %c2_22 = arith.constant 2 : index
    %c0_23 = arith.constant 0 : index
    %50 = vector.load %arg5[%c2_22, %c0_23] : memref<3x128xf32, #tpu.memory_space<vmem>>, vector<1x128xf32>
    %51 = vector.broadcast %50 : vector<1x128xf32> to vector<128x128xf32>
    %52 = arith.mulf %49, %51 : vector<128x128xf32>
    %53 = vector.extract_strided_slice %52 {offsets = [0, 0], sizes = [8, 128], strides = [1, 1]} : vector<128x128xf32> to vector<8x128xf32>
    %54 = vector.extract_strided_slice %52 {offsets = [8, 0], sizes = [8, 128], strides = [1, 1]} : vector<128x128xf32> to vector<8x128xf32>
    %55 = arith.addf %53, %54 : vector<8x128xf32>
    %56 = vector.extract_strided_slice %52 {offsets = [16, 0], sizes = [8, 128], strides = [1, 1]} : vector<128x128xf32> to vector<8x128xf32>
    %57 = arith.addf %55, %56 : vector<8x128xf32>
    %58 = vector.extract_strided_slice %52 {offsets = [24, 0], sizes = [8, 128], strides = [1, 1]} : vector<128x128xf32> to vector<8x128xf32>
    %59 = arith.addf %57, %58 : vector<8x128xf32>
    %60 = vector.extract_strided_slice %52 {offsets = [32, 0], sizes = [8, 128], strides = [1, 1]} : vector<128x128xf32> to vector<8x128xf32>
    %61 = arith.addf %59, %60 : vector<8x128xf32>
    %62 = vector.extract_strided_slice %52 {offsets = [40, 0], sizes = [8, 128], strides = [1, 1]} : vector<128x128xf32> to vector<8x128xf32>
    %63 = arith.addf %61, %62 : vector<8x128xf32>
    %64 = vector.extract_strided_slice %52 {offsets = [48, 0], sizes = [8, 128], strides = [1, 1]} : vector<128x128xf32> to vector<8x128xf32>
    %65 = arith.addf %63, %64 : vector<8x128xf32>
    %66 = vector.extract_strided_slice %52 {offsets = [56, 0], sizes = [8, 128], strides = [1, 1]} : vector<128x128xf32> to vector<8x128xf32>
    %67 = arith.addf %65, %66 : vector<8x128xf32>
    %68 = vector.extract_strided_slice %52 {offsets = [64, 0], sizes = [8, 128], strides = [1, 1]} : vector<128x128xf32> to vector<8x128xf32>
    %69 = arith.addf %67, %68 : vector<8x128xf32>
    %70 = vector.extract_strided_slice %52 {offsets = [72, 0], sizes = [8, 128], strides = [1, 1]} : vector<128x128xf32> to vector<8x128xf32>
    %71 = arith.addf %69, %70 : vector<8x128xf32>
    %72 = vector.extract_strided_slice %52 {offsets = [80, 0], sizes = [8, 128], strides = [1, 1]} : vector<128x128xf32> to vector<8x128xf32>
    %73 = arith.addf %71, %72 : vector<8x128xf32>
    %74 = vector.extract_strided_slice %52 {offsets = [88, 0], sizes = [8, 128], strides = [1, 1]} : vector<128x128xf32> to vector<8x128xf32>
    %75 = arith.addf %73, %74 : vector<8x128xf32>
    %76 = vector.extract_strided_slice %52 {offsets = [96, 0], sizes = [8, 128], strides = [1, 1]} : vector<128x128xf32> to vector<8x128xf32>
    %77 = arith.addf %75, %76 : vector<8x128xf32>
    %78 = vector.extract_strided_slice %52 {offsets = [104, 0], sizes = [8, 128], strides = [1, 1]} : vector<128x128xf32> to vector<8x128xf32>
    %79 = arith.addf %77, %78 : vector<8x128xf32>
    %80 = vector.extract_strided_slice %52 {offsets = [112, 0], sizes = [8, 128], strides = [1, 1]} : vector<128x128xf32> to vector<8x128xf32>
    %81 = arith.addf %79, %80 : vector<8x128xf32>
    %82 = vector.extract_strided_slice %52 {offsets = [120, 0], sizes = [8, 128], strides = [1, 1]} : vector<128x128xf32> to vector<8x128xf32>
    %83 = arith.addf %81, %82 : vector<8x128xf32>
    %84 = arith.cmpi eq, %1, %3 : i32
    %cst_24 = arith.constant 1.000000e+00 : f32
    %cst_25 = arith.constant 2.000000e+00 : f32
    %85 = arith.select %84, %cst_24, %cst_25 : f32
    %86 = arith.cmpi eq, %3, %1 : i32
    %87 = arith.extui %86 : i1 to i32
    %c0_i32 = arith.constant 0 : i32
    %88 = arith.cmpi ne, %87, %c0_i32 : i32
    scf.if %88 {
      %cst_30 = arith.constant 0.000000e+00 : f32
      %94 = vector.broadcast %cst_30 : f32 to vector<8x128xf32>
      %c0_31 = arith.constant 0 : index
      %c0_32 = arith.constant 0 : index
      %95 = vector.load %arg10[%c0_31, %c0_32] : memref<8x128xf32, #tpu.memory_space<vmem>>, vector<8x128xf32>
      tpu.vector_store %arg10[%c0_31, %c0_32], %94 {strides = array<i32>} : memref<8x128xf32, #tpu.memory_space<vmem>>, vector<8x128xf32>,
    } else {
    }
    %c0_26 = arith.constant 0 : index
    %c0_27 = arith.constant 0 : index
    %89 = vector.load %arg10[%c0_26, %c0_27] : memref<8x128xf32, #tpu.memory_space<vmem>>, vector<8x128xf32>
    %90 = vector.broadcast %85 : f32 to vector<8x128xf32>
    %91 = arith.mulf %90, %83 : vector<8x128xf32>
    %92 = arith.addf %89, %91 : vector<8x128xf32>
    %c0_28 = arith.constant 0 : index
    %c0_29 = arith.constant 0 : index
    %93 = vector.load %arg10[%c0_28, %c0_29] : memref<8x128xf32, #tpu.memory_space<vmem>>, vector<8x128xf32>
    tpu.vector_store %arg10[%c0_28, %c0_29], %92 {strides = array<i32>} : memref<8x128xf32, #tpu.memory_space<vmem>>, vector<8x128xf32>,
    return
  }
  func.func @transform_0(%arg0: i32, %arg1: memref<1xi32, #tpu.memory_space<smem>>, %arg2: memref<1xi32, #tpu.memory_space<smem>>) -> i32 {
    %c0_i32 = arith.constant 0 : i32
    %c0_i32_0 = arith.constant 0 : i32
    return %c0_i32 : i32
  }
  func.func @transform_1(%arg0: i32, %arg1: memref<1xi32, #tpu.memory_space<smem>>, %arg2: memref<1xi32, #tpu.memory_space<smem>>) -> (i32, i32) {
    %0 = arith.index_cast %arg0 : i32 to index
    %1 = memref.load %arg1[%0] : memref<1xi32, #tpu.memory_space<smem>>
    %c0_i32 = arith.constant 0 : i32
    %c0_i32_0 = arith.constant 0 : i32
    return %1, %c0_i32 : i32, i32
  }
  func.func @transform_2(%arg0: i32, %arg1: memref<1xi32, #tpu.memory_space<smem>>, %arg2: memref<1xi32, #tpu.memory_space<smem>>) -> (i32, i32) {
    %0 = arith.index_cast %arg0 : i32 to index
    %1 = memref.load %arg2[%0] : memref<1xi32, #tpu.memory_space<smem>>
    %c0_i32 = arith.constant 0 : i32
    %c0_i32_0 = arith.constant 0 : i32
    return %c0_i32, %1 : i32, i32
  }
  func.func @transform_3(%arg0: i32, %arg1: memref<1xi32, #tpu.memory_space<smem>>, %arg2: memref<1xi32, #tpu.memory_space<smem>>) -> (i32, i32) {
    %0 = arith.index_cast %arg0 : i32 to index
    %1 = memref.load %arg1[%0] : memref<1xi32, #tpu.memory_space<smem>>
    %c0_i32 = arith.constant 0 : i32
    %c0_i32_0 = arith.constant 0 : i32
    return %1, %c0_i32 : i32, i32
  }
  func.func @transform_4(%arg0: i32, %arg1: memref<1xi32, #tpu.memory_space<smem>>, %arg2: memref<1xi32, #tpu.memory_space<smem>>) -> (i32, i32) {
    %0 = arith.index_cast %arg0 : i32 to index
    %1 = memref.load %arg1[%0] : memref<1xi32, #tpu.memory_space<smem>>
    %c0_i32 = arith.constant 0 : i32
    %c0_i32_0 = arith.constant 0 : i32
    return %1, %c0_i32 : i32, i32
  }
  func.func @transform_5(%arg0: i32, %arg1: memref<1xi32, #tpu.memory_space<smem>>, %arg2: memref<1xi32, #tpu.memory_space<smem>>) -> (i32, i32) {
    %0 = arith.index_cast %arg0 : i32 to index
    %1 = memref.load %arg2[%0] : memref<1xi32, #tpu.memory_space<smem>>
    %c0_i32 = arith.constant 0 : i32
    %c0_i32_0 = arith.constant 0 : i32
    return %c0_i32, %1 : i32, i32
  }
  func.func @transform_6(%arg0: i32, %arg1: memref<1xi32, #tpu.memory_space<smem>>, %arg2: memref<1xi32, #tpu.memory_space<smem>>) -> (i32, i32) {
    %0 = arith.index_cast %arg0 : i32 to index
    %1 = memref.load %arg2[%0] : memref<1xi32, #tpu.memory_space<smem>>
    %c0_i32 = arith.constant 0 : i32
    %c0_i32_0 = arith.constant 0 : i32
    return %c0_i32, %1 : i32, i32
  }
  func.func @transform_7(%arg0: i32, %arg1: memref<1xi32, #tpu.memory_space<smem>>, %arg2: memref<1xi32, #tpu.memory_space<smem>>) -> (i32, i32) {
    %0 = arith.index_cast %arg0 : i32 to index
    %1 = memref.load %arg1[%0] : memref<1xi32, #tpu.memory_space<smem>>
    %c0_i32 = arith.constant 0 : i32
    %c0_i32_0 = arith.constant 0 : i32
    return %1, %c0_i32 : i32, i32
  }
}

</mosaic_0001>

<bundles_post_ra>
// kernel: jmmd_loss.1
= control target key start
LH: loop header
LB: loop body
LE: loop exit
PB: predicated region body
PF: predicated region fallthrough
CT: control target
= control target key end

     0   :  { %16 = vsyncpa [#allocation6], 0  ;;  %s2000_s0 = inlined_call_operand.<no memory space> [shape: s32[1], index: 0, kind: input, shape index: {}, may-alias: {0,1}]   ;;  %s2001_s1 = inlined_call_operand.<no memory space> [shape: s32[1], index: 1, kind: input, shape index: {}, may-alias: {0,1}]   ;;  %s2002_s2 = inlined_call_operand.vmem [shape: f32[2], index: 2, kind: input, shape index: {}]   ;;  %s2003_s3 = inlined_call_operand.vmem [shape: f32[128,3], index: 3, kind: input, shape index: {}]   ;;  %s2004_s4 = inlined_call_operand.vmem [shape: f32[3,128], index: 4, kind: input, shape index: {}]   ;;  %s2005_s5 = inlined_call_operand.vmem [shape: f32[128,128], index: 5, kind: input, shape index: {}]   ;;  %s2006_s6 = inlined_call_operand.vmem [shape: f32[128,128], index: 6, kind: input, shape index: {}]   ;;  %s2007_s7 = inlined_call_operand.vmem [shape: f32[128,128], index: 7, kind: input, shape index: {}]   ;;  %s2008_s8 = inlined_call_operand.vmem [shape: f32[128,128], index: 8, kind: input, shape index: {}]   ;;  %s2009_s9 = inlined_call_operand.vmem [shape: f32[8,128], index: 9, kind: output, shape index: {}]  }
   0x1   :  { %s23_s11 = sshll.u32 %s2002_s2, 4  ;;  %s24_s11 = int_to_ptr.vmem [resolvable:$true] %s23_s11 }
   0x2   :  { %s1525_s12 = scalar_lea.vmem %s24_s11, 16  ;;  %p1530_p1 = scmp.lt.s32.totalorder %s24_s11, %s24_s11 }
   0x3   :  { %p1526_p0 = scmp.ne.s32.totalorder %s24_s11, %s1525_s12  ;;  %p1531_p2 = scmp.lt.s32.totalorder %s1525_s12, %s1525_s12 }
   0x5   :  { %p1532_p3 = por %p1531_p2, %p1530_p1 }
   0x7   :  { %p1533_p4 = pnand %p1532_p3, %p1526_p0 }
   0x9   :  { %1536 = shalt.err (!%p1533_p4)
}
   0xa   :  { %s1539_s13 = smov [#allocation5]  }
   0xb   :  { %26 = dma.vmem_to_smem %s24_s11, 16, %s1539_s13, [#allocation6]  }
   0xc   :  { %1537 = dma.done.wait [#allocation6], 16  }
   0xd   :  { %1538 = vsyncadd [#allocation6], 4294967280 }
   0xe   :  { %84 = sfence }
   0xf   :  { %p132_p5 = scmp.lt.s32.totalorder %s2001_s1, 0  ;;  %p166_p6 = scmp.lt.s32.totalorder %s2000_s0, 0  ;;  %v1540_v0 = vmov 0  }
  0x10   :  { %1454 = vset.pattern.permute.xlu1 %v1540_v0  ;;  %1453 = vset.pattern.permute.xlu0 %v1540_v0  ;;  %p1185_p8 = scmp.eq.s32.totalorder %s2000_s0, %s2001_s1  ;;  %p1271_p9 = scmp.ne.s32.totalorder %s2001_s1, %s2000_s0 }
  0x11   :  { %s1606_s19 = scalar_select %p132_p5, %s2001_s1, 0 }
  0x12   :  { %s167_s22 = scalar_select %p166_p6, %s2000_s0, 0 }
  0x13   :  { %s1264_s23 = sshll.u32 %s1606_s19, 3  ;;  %s1259_s25 = sshll.u32 %s1606_s19, 2 }
  0x14   :  { %s1615_s26 = scalar_lea.vmem %s2007_s7, %s1264_s23  ;;  %s1266_s27 = sshll.u32 %s167_s22, 3 }
  0x15   :  { %s1620_s30 = scalar_lea.vmem %s2009_s9, %s1266_s27  ;;  %v204_v1 = vld [vmem:[%s1615_s26 + $0x78] sm:$0xff]  ;;  %s1626_s12 = scalar_lea.vmem %s2008_s8, %s1264_s23  ;;  %v203_v2 = vld [vmem:[%s1615_s26 + $0x70] sm:$0xff]  ;;  %v202_v5 = vld [vmem:[%s1615_s26 + $0x68] sm:$0xff] }
  0x16   :  { %1336 = vmatprep.subr.mxu0 %v204_v1  ;;  %v381_v3 = vld [vmem:[%s1626_s12 + $0x78] sm:$0xff]  ;;  %v380_v4 = vld [vmem:[%s1626_s12 + $0x70] sm:$0xff]  ;;  %v379_v6 = vld [vmem:[%s1626_s12 + $0x68] sm:$0xff]  ;;  %s1257_s9 = sshll.u32 %s2000_s0, 4  ;;  %s1269_s27 = sld [smem:[#allocation5 + $0x1]] }
  0x17   :  { %1392 = vmatprep.subr.mxu1 %v381_v3  ;;  %1337 = vmatpush3.msra.mxu0 %v204_v1  ;;  %v201_v7 = vld [vmem:[%s1615_s26 + $0x60] sm:$0xff]  ;;  %v200_v9 = vld [vmem:[%s1615_s26 + $0x58] sm:$0xff]  ;;  %v199_v11 = vld [vmem:[%s1615_s26 + $0x50] sm:$0xff]  ;;  %p125_p7 = scmp.lt.s32.totalorder %s1257_s9, 15  ;;  %s1792_s10 = scalar_lea.vmem %s2004_s4, %s1259_s25 }
  0x18   :  { %1393 = vmatpush3.msra.mxu1 %v381_v3  ;;  %1338 = vmatprep.subr.mxu0 %v203_v2  ;;  %v378_v8 = vld [vmem:[%s1626_s12 + $0x60] sm:$0xff]  ;;  %v377_v10 = vld [vmem:[%s1626_s12 + $0x58] sm:$0xff]  ;;  %v376_v12 = vld [vmem:[%s1626_s12 + $0x50] sm:$0xff]  ;;  %s1786_s24 = scalar_select %p1185_p8, 1.0, 2.0 }
  0x19   :  { %1394 = vmatprep.subr.mxu1 %v380_v4  ;;  %1339 = vmatpush3.msra.mxu0 %v203_v2  ;;  %v198_v13 = vld [vmem:[%s1615_s26 + $0x48] sm:$0xff]  ;;  %v197_v15 = vld [vmem:[%s1615_s26 + $0x40] sm:$0xff]  ;;  %v196_v17 = vld [vmem:[%s1615_s26 + $0x38] sm:$0xff]  ;;  %s2011_s9 = smov (!%p125_p7, %s1257_s9), 15 }
  0x1a   :  { %1395 = vmatpush3.msra.mxu1 %v380_v4  ;;  %1340 = vmatprep.subr.mxu0 %v202_v5  ;;  %v375_v14 = vld [vmem:[%s1626_s12 + $0x48] sm:$0xff]  ;;  %v374_v16 = vld [vmem:[%s1626_s12 + $0x40] sm:$0xff]  ;;  %v373_v18 = vld [vmem:[%s1626_s12 + $0x38] sm:$0xff]  ;;  %s1258_s13 = sshll.u32 %s2011_s9, 3 }
  0x1b   :  { %1396 = vmatprep.subr.mxu1 %v379_v6  ;;  %1341 = vmatpush3.msra.mxu0 %v202_v5  ;;  %v195_v19 = vld [vmem:[%s1615_s26 + $0x30] sm:$0xff]  ;;  %v194_v21 = vld [vmem:[%s1615_s26 + $0x28] sm:$0xff]  ;;  %v193_v23 = vld [vmem:[%s1615_s26 + $0x20] sm:$0xff]  ;;  %s1663_s16 = scalar_lea.vmem %s2005_s5, %s1258_s13  ;;  %s1669_s18 = scalar_lea.vmem %s2006_s6, %s1258_s13 }
  0x1c   :  { %1397 = vmatpush3.msra.mxu1 %v379_v6  ;;  %1342 = vmatprep.subr.mxu0 %v201_v7  ;;  %v372_v20 = vld [vmem:[%s1626_s12 + $0x30] sm:$0xff]  ;;  %v371_v22 = vld [vmem:[%s1626_s12 + $0x28] sm:$0xff]  ;;  %v370_v24 = vld [vmem:[%s1626_s12 + $0x20] sm:$0xff]  ;;  %s1676_s21 = scalar_lea.vmem %s2003_s3, %s1258_s13 }
  0x1d   :  { %1398 = vmatprep.subr.mxu1 %v378_v8  ;;  %1343 = vmatpush3.msra.mxu0 %v201_v7  ;;  %v192_v25 = vld [vmem:[%s1615_s26 + $0x18] sm:$0xff]  ;;  %v191_v27 = vld [vmem:[%s1615_s26 + $0x10] sm:$0xff]  ;;  %v190_v29 = vld [vmem:[%s1615_s26 + $0x8] sm:$0xff] }
  0x1e   :  { %1399 = vmatpush3.msra.mxu1 %v378_v8  ;;  %1344 = vmatprep.subr.mxu0 %v200_v9  ;;  %v369_v26 = vld [vmem:[%s1626_s12 + $0x18] sm:$0xff]  ;;  %v368_v28 = vld [vmem:[%s1626_s12 + $0x10] sm:$0xff]  ;;  %v367_v30 = vld [vmem:[%s1626_s12 + $0x8] sm:$0xff] }
  0x1f   :  { %1400 = vmatprep.subr.mxu1 %v377_v10  ;;  %1345 = vmatpush3.msra.mxu0 %v200_v9  ;;  %v189_v31 = vld [vmem:[%s1615_s26] sm:$0xff]  ;;  %v174_v35 = vld [vmem:[%s1663_s16 + $0x8] sm:$0xff]  ;;  %v175_v37 = vld [vmem:[%s1663_s16 + $0x10] sm:$0xff]  ;;  %s825_s26 = sld [smem:[#allocation5]] }
  0x20   :  { %1401 = vmatpush3.msra.mxu1 %v377_v10  ;;  %1346 = vmatprep.subr.mxu0 %v199_v11  ;;  %v366_v32 = vld [vmem:[%s1626_s12] sm:$0xff]  ;;  %v351_v36 = vld [vmem:[%s1669_s18 + $0x8] sm:$0xff]  ;;  %v352_v38 = vld [vmem:[%s1669_s18 + $0x10] sm:$0xff] }
  0x21   :  { %1402 = vmatprep.subr.mxu1 %v376_v12  ;;  %1347 = vmatpush3.msra.mxu0 %v199_v11  ;;  %v173_v33 = vld [vmem:[%s1663_s16] sm:$0xff]  ;;  %v1684_v39 = vld [vmem:[%s1676_s21 + $0x10] sm:$0xff]  ;;  %v176_v41 = vld [vmem:[%s1663_s16 + $0x18] sm:$0xff] }
  0x22   :  { %1403 = vmatpush3.msra.mxu1 %v376_v12  ;;  %1348 = vmatprep.subr.mxu0 %v198_v13  ;;  %v350_v34 = vld [vmem:[%s1669_s18] sm:$0xff]  ;;  %v353_v42 = vld [vmem:[%s1669_s18 + $0x18] sm:$0xff]  ;;  %v1699_v46 = vld [vmem:[%s1676_s21 + $0x8] sm:$0xff] }
  0x23   :  { %1404 = vmatprep.subr.mxu1 %v375_v14  ;;  %1349 = vmatpush3.msra.mxu0 %v198_v13  ;;  %v1687_v40 = vld [vmem:[%s1676_s21] sm:$0xff]  ;;  %v1695_v45 = vld [vmem:[%s1676_s21 + $0x18] sm:$0xff]  ;;  %v178_v47 = vld [vmem:[%s1663_s16 + $0x28] sm:$0xff] }
  0x24   :  { %1405 = vmatpush3.msra.mxu1 %v375_v14  ;;  %1350 = vmatprep.subr.mxu0 %v197_v15  ;;  %v177_v43 = vld [vmem:[%s1663_s16 + $0x20] sm:$0xff]  ;;  %v355_v48 = vld [vmem:[%s1669_s18 + $0x28] sm:$0xff]  ;;  %v179_v49 = vld [vmem:[%s1663_s16 + $0x30] sm:$0xff] }
  0x25   :  { %1406 = vmatprep.subr.mxu1 %v374_v16  ;;  %1351 = vmatpush3.msra.mxu0 %v197_v15  ;;  %v354_v44 = vld [vmem:[%s1669_s18 + $0x20] sm:$0xff]  ;;  %v356_v50 = vld [vmem:[%s1669_s18 + $0x30] sm:$0xff]  ;;  %v1707_v51 = vld [vmem:[%s1676_s21 + $0x28] sm:$0xff] }
  0x26   :  { %1407 = vmatpush3.msra.mxu1 %v374_v16  ;;  %1352 = vmatprep.subr.mxu0 %v196_v17  ;;  %v1711_v52 = vld [vmem:[%s1676_s21 + $0x20] sm:$0xff]  ;;  %v180_v53 = vld [vmem:[%s1663_s16 + $0x38] sm:$0xff]  ;;  %v1723_v58 = vld [vmem:[%s1676_s21 + $0x30] sm:$0xff] }
  0x27   :  { %1408 = vmatprep.subr.mxu1 %v373_v18  ;;  %1353 = vmatpush3.msra.mxu0 %v196_v17  ;;  %v357_v54 = vld [vmem:[%s1669_s18 + $0x38] sm:$0xff]  ;;  %v181_v55 = vld [vmem:[%s1663_s16 + $0x40] sm:$0xff]  ;;  %v182_v59 = vld [vmem:[%s1663_s16 + $0x48] sm:$0xff]  ;;  %v1541_v17 = vmov 1  }
  0x28   :  { %1409 = vmatpush3.msra.mxu1 %v373_v18  ;;  %1354 = vmatprep.subr.mxu0 %v195_v19  ;;  %v358_v56 = vld [vmem:[%s1669_s18 + $0x40] sm:$0xff]  ;;  %v1719_v57 = vld [vmem:[%s1676_s21 + $0x38] sm:$0xff]  ;;  %v359_v60 = vld [vmem:[%s1669_s18 + $0x48] sm:$0xff]  ;;  %v1542_v18 = vmov 2  }
  0x29   :  { %1410 = vmatprep.subr.mxu1 %v372_v20  ;;  %1355 = vmatpush3.msra.mxu0 %v195_v19  ;;  %v183_v61 = vld [vmem:[%s1663_s16 + $0x50] sm:$0xff]  ;;  %v1731_v63 = vld [vmem:[%s1676_s21 + $0x48] sm:$0xff]  ;;  %v1735_v0 = vld [vmem:[%s1676_s21 + $0x40] sm:$0xff] }
  0x2a   :  { %1411 = vmatpush3.msra.mxu1 %v372_v20  ;;  %1356 = vmatprep.subr.mxu0 %v194_v21  ;;  %v360_v62 = vld [vmem:[%s1669_s18 + $0x50] sm:$0xff]  ;;  %v184_v1 = vld [vmem:[%s1663_s16 + $0x58] sm:$0xff]  ;;  %v185_v3 = vld [vmem:[%s1663_s16 + $0x60] sm:$0xff] }
  0x2b   :  { %1412 = vmatprep.subr.mxu1 %v371_v22  ;;  %1357 = vmatpush3.msra.mxu0 %v194_v21  ;;  %v361_v2 = vld [vmem:[%s1669_s18 + $0x58] sm:$0xff]  ;;  %v362_v4 = vld [vmem:[%s1669_s18 + $0x60] sm:$0xff]  ;;  %v537_v6 = vld [vmem:[%s1676_s21 + $0x50] sm:$0xff] }
  0x2c   :  { %1413 = vmatpush3.msra.mxu1 %v371_v22  ;;  %1358 = vmatprep.subr.mxu0 %v193_v23  ;;  %v1743_v5 = vld [vmem:[%s1676_s21 + $0x58] sm:$0xff]  ;;  %v186_v7 = vld [vmem:[%s1663_s16 + $0x68] sm:$0xff]  ;;  %v187_v9 = vld [vmem:[%s1663_s16 + $0x70] sm:$0xff] }
  0x2d   :  { %1414 = vmatprep.subr.mxu1 %v370_v24  ;;  %1359 = vmatpush3.msra.mxu0 %v193_v23  ;;  %v363_v8 = vld [vmem:[%s1669_s18 + $0x68] sm:$0xff]  ;;  %v364_v10 = vld [vmem:[%s1669_s18 + $0x70] sm:$0xff]  ;;  %v539_v12 = vld [vmem:[%s1676_s21 + $0x60] sm:$0xff] }
  0x2e   :  { %1415 = vmatpush3.msra.mxu1 %v370_v24  ;;  %1360 = vmatprep.subr.mxu0 %v192_v25  ;;  %v540_v11 = vld [vmem:[%s1676_s21 + $0x68] sm:$0xff]  ;;  %v188_v13 = vld [vmem:[%s1663_s16 + $0x78] sm:$0xff]  ;;  %v541_v16 = vld [vmem:[%s1676_s21 + $0x70] sm:$0xff] }
  0x2f   :  { %1416 = vmatprep.subr.mxu1 %v369_v26  ;;  %1361 = vmatpush3.msra.mxu0 %v192_v25  ;;  %v365_v14 = vld [vmem:[%s1669_s18 + $0x78] sm:$0xff] }
  0x30   :  { %1417 = vmatpush3.msra.mxu1 %v369_v26  ;;  %1362 = vmatprep.subr.mxu0 %v191_v27  ;;  %v542_v15 = vld [vmem:[%s1676_s21 + $0x78] sm:$0xff] }
  0x31   :  { %1418 = vmatprep.subr.mxu1 %v368_v28  ;;  %1363 = vmatpush3.msra.mxu0 %v191_v27 }
  0x32   :  { %1419 = vmatpush3.msra.mxu1 %v368_v28  ;;  %1364 = vmatprep.subr.mxu0 %v190_v29 }
  0x33   :  { %1420 = vmatprep.subr.mxu1 %v367_v30  ;;  %1365 = vmatpush3.msra.mxu0 %v190_v29 }
  0x34   :  { %1421 = vmatpush3.msra.mxu1 %v367_v30  ;;  %1366 = vmatprep.subr.mxu0 %v189_v31 }
  0x35   :  { %1422 = vmatprep.subr.mxu1 %v366_v32  ;;  %1367 = vmatpush3.msra.mxu0 %v189_v31 }
  0x36   :  { %1368 = vmatprep.mubr.f32.mxu0 %v173_v33  ;;  %1423 = vmatpush3.msra.mxu1 %v366_v32 }
  0x37   :  { %1424 = vmatprep.mubr.f32.mxu1 %v350_v34  ;;  %1369 = vmatmul.mubr.f32.vlgmr.msra.gmra.mxu0 %v174_v35 }
  0x38   :  { %1425 = vmatmul.mubr.f32.vlgmr.msra.gmra.mxu1 %v351_v36  ;;  %1371 = vmatprep.mubr.f32.mxu0 %v175_v37 }
  0x39   :  { %1427 = vmatprep.mubr.f32.mxu1 %v352_v38  ;;  %556 = vperm.xlu1 %1454, %v1684_v39  }
  0x3a   :  { %546 = vperm.xlu0 %1453, %v1687_v40  }
  0x3b   :  { %1372 = vmatmul.mubr.f32.gmra.mxu0 %v176_v41 }
  0x3c   :  { %1428 = vmatmul.mubr.f32.gmra.mxu1 %v353_v42  ;;  %1374 = vmatprep.mubr.f32.mxu0 %v177_v43 }
  0x3d   :  { %1430 = vmatprep.mubr.f32.mxu1 %v354_v44  ;;  %561 = vperm.xlu1 %1454, %v1695_v45   ;;  %v1267_v44 = vld [vmem:[%s1792_s10] ss:$0 sm:$0xff] }
  0x3e   :  { %551 = vperm.xlu0 %1453, %v1699_v46  }
  0x3f   :  { %1375 = vmatmul.mubr.f32.gmra.mxu0 %v178_v47 }
  0x40   :  { %1431 = vmatmul.mubr.f32.gmra.mxu1 %v355_v48  ;;  %1377 = vmatprep.mubr.f32.mxu0 %v179_v49  ;;  %v1797_v48 = vstv %s825_s26  ;;  %v1799_v49 = vstv %s1269_s27 }
  0x41   :  { %1433 = vmatprep.mubr.f32.mxu1 %v356_v50  ;;  %571 = vperm.xlu1 %1454, %v1707_v51  }
  0x42   :  { %566 = vperm.xlu0 %1453, %v1711_v52  }
  0x43   :  { %1378 = vmatmul.mubr.f32.gmra.mxu0 %v180_v53 }
  0x44   :  { %1434 = vmatmul.mubr.f32.gmra.mxu1 %v357_v54  ;;  %1380 = vmatprep.mubr.f32.mxu0 %v181_v55  ;;  %v1808_v54 = vld [vmem:[%s1792_s10 + $0x1] ss:$0 sm:$0xff] }
  0x45   :  { %1436 = vmatprep.mubr.f32.mxu1 %v358_v56  ;;  %581 = vperm.xlu1 %1454, %v1719_v57  }
  0x46   :  { %576 = vperm.xlu0 %1453, %v1723_v58  }
  0x47   :  { %1381 = vmatmul.mubr.f32.gmra.mxu0 %v182_v59 }
  0x48   :  { %1437 = vmatmul.mubr.f32.gmra.mxu1 %v359_v60  ;;  %1383 = vmatprep.mubr.f32.mxu0 %v183_v61 }
  0x49   :  { %1439 = vmatprep.mubr.f32.mxu1 %v360_v62  ;;  %591 = vperm.xlu1 %1454, %v1731_v63  }
  0x4a   :  { %586 = vperm.xlu0 %1453, %v1735_v0  }
  0x4b   :  { %1384 = vmatmul.mubr.f32.gmra.mxu0 %v184_v1 }
  0x4c   :  { %1440 = vmatmul.mubr.f32.gmra.mxu1 %v361_v2  ;;  %1386 = vmatprep.mubr.f32.mxu0 %v185_v3 }
  0x4d   :  { %1442 = vmatprep.mubr.f32.mxu1 %v362_v4  ;;  %601 = vperm.xlu1 %1454, %v1743_v5  }
  0x4e   :  { %596 = vperm.xlu0 %1453, %v537_v6  }
  0x4f   :  { %1387 = vmatmul.mubr.f32.gmra.mxu0 %v186_v7 }
  0x50   :  { %1443 = vmatmul.mubr.f32.gmra.mxu1 %v363_v8  ;;  %1389 = vmatprep.mubr.f32.mxu0 %v187_v9 }
  0x51   :  { %1445 = vmatprep.mubr.f32.mxu1 %v364_v10  ;;  %611 = vperm.xlu1 %1454, %v540_v11  }
  0x52   :  { %606 = vperm.xlu0 %1453, %v539_v12  }
  0x53   :  { %1390 = vmatmul.mubr.f32.gmra.mxu0 %v188_v13 }
  0x54   :  { %1446 = vmatmul.mubr.f32.gmra.mxu1 %v365_v14 }
  0x55   :  { %621 = vperm.xlu1 %1454, %v542_v15  }
  0x56   :  { %616 = vperm.xlu0 %1453, %v541_v16  }
  0x59   :  { %1456 = vset.pattern.permute.xlu1 %v1541_v17 }
  0x5a   :  { %698 = vperm.xlu1 %1456, %v1699_v46   ;;  %1455 = vset.pattern.permute.xlu0 %v1541_v17 }
  0x5b   :  { %694 = vperm.xlu0 %1455, %v1687_v40  }
  0x5e   :  { %702 = vperm.xlu1 %1456, %v1684_v39  }
  0x5f   :  { %706 = vperm.xlu0 %1455, %v1695_v45  }
  0x62   :  { %710 = vperm.xlu1 %1456, %v1711_v52  }
  0x63   :  { %714 = vperm.xlu0 %1455, %v1707_v51  }
  0x66   :  { %718 = vperm.xlu1 %1456, %v1723_v58  }
  0x67   :  { %722 = vperm.xlu0 %1455, %v1719_v57  }
  0x6a   :  { %726 = vperm.xlu1 %1456, %v1735_v0  }
  0x6b   :  { %730 = vperm.xlu0 %1455, %v1731_v63  }
  0x6e   :  { %734 = vperm.xlu1 %1456, %v537_v6  }
  0x6f   :  { %738 = vperm.xlu0 %1455, %v1743_v5  }
  0x72   :  { %742 = vperm.xlu1 %1456, %v539_v12  }
  0x73   :  { %746 = vperm.xlu0 %1455, %v540_v11  }
  0x76   :  { %750 = vperm.xlu1 %1456, %v541_v16  }
  0x77   :  { %1457 = vset.pattern.permute.xlu0 %v1542_v18 }
  0x78   :  { %1070 = vperm.xlu0 %1457, %v1687_v40  }
  0x7a   :  { %1458 = vset.pattern.permute.xlu1 %v1542_v18 }
  0x7b   :  { %1074 = vperm.xlu1 %1458, %v1699_v46  }
  0x7c   :  { %1078 = vperm.xlu0 %1457, %v1684_v39  }
  0x7f   :  { %1459 = vset.pattern.permute.xlu1 %v1541_v17 }
  0x80   :  { %754 = vperm.xlu1 %1459, %v542_v15   ;;  %1086 = vperm.xlu0 %1457, %v1711_v52  }
  0x84   :  { %1460 = vset.pattern.permute.xlu1 %v1542_v18  ;;  %1094 = vperm.xlu0 %1457, %v1723_v58  }
  0x85   :  { %1082 = vperm.xlu1 %1460, %v1695_v45  }
  0x88   :  { %1102 = vperm.xlu0 %1457, %v1735_v0  }
  0x89   :  { %1090 = vperm.xlu1 %1460, %v1707_v51  }
  0x8c   :  { %1110 = vperm.xlu0 %1457, %v537_v6  }
  0x8d   :  { %1098 = vperm.xlu1 %1460, %v1719_v57  }
  0x90   :  { %1118 = vperm.xlu0 %1457, %v539_v12  }
  0x91   :  { %1106 = vperm.xlu1 %1460, %v1731_v63  }
  0x94   :  { %1126 = vperm.xlu0 %1457, %v541_v16  }
  0x95   :  { %1114 = vperm.xlu1 %1460, %v1743_v5  }
  0x99   :  { %1122 = vperm.xlu1 %1460, %v540_v11  }
  0x9d   :  { %1130 = vperm.xlu1 %1460, %v542_v15  }
  0xb4   :  { %v557_v19 = vpop.permute.xlu1 %556 }
  0xb5   :  { %v547_v20 = vpop.permute.xlu0 %546  ;;  %v1795_v46 = vadd.f32 %v1267_v44, %v557_v19 }
  0xb6   :  { %v628_v47 = vadd.f32 %v1267_v44, %v547_v20 }
  0xb8   :  { %v562_v21 = vpop.permute.xlu1 %561 }
  0xb9   :  { %v552_v22 = vpop.permute.xlu0 %551  ;;  %v1801_v50 = vadd.f32 %v1267_v44, %v562_v21 }
  0xba   :  { %v629_v52 = vadd.f32 %v1267_v44, %v552_v22 }
  0xbc   :  { %v572_v23 = vpop.permute.xlu1 %571 }
  0xbd   :  { %v567_v24 = vpop.permute.xlu0 %566  ;;  %v1803_v51 = vadd.f32 %v1267_v44, %v572_v23 }
  0xbe   :  { %v1805_v53 = vadd.f32 %v1267_v44, %v567_v24 }
  0xc0   :  { %v582_v25 = vpop.permute.xlu1 %581 }
  0xc1   :  { %v577_v26 = vpop.permute.xlu0 %576  ;;  %v1810_v55 = vadd.f32 %v1267_v44, %v582_v25 }
  0xc2   :  { %v1814_v57 = vadd.f32 %v1267_v44, %v577_v26 }
  0xc4   :  { %v592_v27 = vpop.permute.xlu1 %591 }
  0xc5   :  { %v587_v28 = vpop.permute.xlu0 %586  ;;  %v1812_v56 = vadd.f32 %v1267_v44, %v592_v27 }
  0xc6   :  { %v1816_v58 = vadd.f32 %v1267_v44, %v587_v28 }
  0xc8   :  { %v602_v29 = vpop.permute.xlu1 %601 }
  0xc9   :  { %v597_v30 = vpop.permute.xlu0 %596  ;;  %v1818_v60 = vadd.f32 %v1267_v44, %v602_v29 }
  0xca   :  { %v1822_v62 = vadd.f32 %v1267_v44, %v597_v30 }
  0xcc   :  { %v612_v31 = vpop.permute.xlu1 %611 }
  0xcd   :  { %v607_v32 = vpop.permute.xlu0 %606  ;;  %v1820_v61 = vadd.f32 %v1267_v44, %v612_v31 }
  0xce   :  { %v1824_v63 = vadd.f32 %v1267_v44, %v607_v32 }
  0xd0   :  { %v622_v33 = vpop.permute.xlu1 %621 }
  0xd1   :  { %v617_v34 = vpop.permute.xlu0 %616  ;;  %v1826_v1 = vadd.f32 %v1267_v44, %v622_v33 }
  0xd2   :  { %v1829_v3 = vadd.f32 %v1267_v44, %v617_v34 }
  0xd5   :  { %v699_v35 = vpop.permute.xlu1 %698 }
  0xd6   :  { %v695_v36 = vpop.permute.xlu0 %694  ;;  %v762_v2 = vadd.f32 %v1808_v54, %v699_v35 }
  0xd7   :  { %v761_v4 = vadd.f32 %v1808_v54, %v695_v36 }
  0xd9   :  { %v703_v37 = vpop.permute.xlu1 %702 }
  0xda   :  { %v707_v38 = vpop.permute.xlu0 %706  ;;  %v763_v6 = vadd.f32 %v1808_v54, %v703_v37 }
  0xdb   :  { %v764_v8 = vadd.f32 %v1808_v54, %v707_v38 }
  0xdd   :  { %v711_v39 = vpop.permute.xlu1 %710 }
  0xde   :  { %v715_v40 = vpop.permute.xlu0 %714  ;;  %v1834_v7 = vadd.f32 %v1808_v54, %v711_v39 }
  0xdf   :  { %v1841_v12 = vadd.f32 %v1808_v54, %v715_v40 }
  0xe1   :  { %v719_v41 = vpop.permute.xlu1 %718 }
  0xe2   :  { %v723_v42 = vpop.permute.xlu0 %722  ;;  %v1838_v11 = vadd.f32 %v1808_v54, %v719_v41 }
  0xe3   :  { %v1844_v13 = vadd.f32 %v1808_v54, %v723_v42 }
  0xe5   :  { %v727_v43 = vpop.permute.xlu1 %726 }
  0xe6   :  { %v731_v45 = vpop.permute.xlu0 %730  ;;  %v1847_v16 = vadd.f32 %v1808_v54, %v727_v43 }
  0xe7   :  { %v1850_v17 = vadd.f32 %v1808_v54, %v731_v45 }
  0xe9   :  { %v735_v59 = vpop.permute.xlu1 %734 }
  0xea   :  { %v739_v0 = vpop.permute.xlu0 %738  ;;  %v1853_v21 = vadd.f32 %v1808_v54, %v735_v59 }
  0xeb   :  { %v1856_v25 = vadd.f32 %v1808_v54, %v739_v0 }
  0xed   :  { %v743_v22 = vpop.permute.xlu1 %742 }
  0xee   :  { %v1859_v27 = vadd.f32 %v1808_v54, %v743_v22  ;;  %v747_v32 = vpop.permute.xlu0 %746 }
  0xef   :  { %v1862_v37 = vadd.f32 %v1808_v54, %v747_v32 }
  0xf7   :  { %v1370_v5 = vpop.f32.mrf.mxu0 }
  0xf8   :  { %v645_v9 = vmul.f32 2.0, %v1370_v5  ;;  %v1426_v10 = vpop.f32.mrf.mxu1 }
  0xf9   :  { %v778_v14 = vmul.f32 2.0, %v1426_v10  ;;  %v271_v15 = vpop.f32.mrf.mxu0 }
  0xfa   :  { %v661_v18 = vsub.f32 %v629_v52, %v645_v9  ;;  %v644_v19 = vmul.f32 2.0, %v271_v15  ;;  %v448_v20 = vpop.f32.mrf.mxu1 }
  0xfb   :  { %v794_v23 = vsub.f32 %v762_v2, %v778_v14  ;;  %v777_v24 = vmul.f32 2.0, %v448_v20  ;;  %v1373_v26 = vpop.f32.mrf.mxu0 }
  0xfc   :  { %v677_v28 = vmax.f32 %v661_v18, 0.0  ;;  %v660_v29 = vsub.f32 %v628_v47, %v644_v19  ;;  %v647_v30 = vmul.f32 2.0, %v1373_v26  ;;  %v1429_v31 = vpop.f32.mrf.mxu1 }
  0xfd   :  { %v810_v33 = vmax.f32 %v794_v23, 0.0  ;;  %v793_v34 = vsub.f32 %v761_v4, %v777_v24  ;;  %v780_v35 = vmul.f32 2.0, %v1429_v31  ;;  %v281_v36 = vpop.f32.mrf.mxu0 }
  0xfe   :  { %v828_v38 = vmul.f32 %v1797_v48, %v677_v28  ;;  %v676_v39 = vmax.f32 %v660_v29, 0.0  ;;  %v663_v40 = vsub.f32 %v1801_v50, %v647_v30  ;;  %v646_v41 = vmul.f32 2.0, %v281_v36  ;;  %v458_v42 = vpop.f32.mrf.mxu1 }
  0xff   :  { %v1006_v43 = vmul.f32 %v1799_v49, %v810_v33  ;;  %v809_v44 = vmax.f32 %v793_v34, 0.0  ;;  %v796_v45 = vsub.f32 %v764_v8, %v780_v35  ;;  %v779_v47 = vmul.f32 2.0, %v458_v42  ;;  %v1376_v52 = vpop.f32.mrf.mxu0 }
 0x100   :  { %v845_v59 = vmul.f32 1.442695, %v828_v38  ;;  %v827_v0 = vmul.f32 %v1797_v48, %v676_v39  ;;  %v679_v2 = vmax.f32 %v663_v40, 0.0  ;;  %v662_v4 = vsub.f32 %v1795_v46, %v646_v41  ;;  %v1432_v5 = vpop.f32.mrf.mxu1  ;;  %v751_v46 = vpop.permute.xlu1 %750 }
 0x101   :  { %v1023_v9 = vmul.f32 1.442695, %v1006_v43  ;;  %v1005_v10 = vmul.f32 %v1799_v49, %v809_v44  ;;  %v812_v14 = vmax.f32 %v796_v45, 0.0  ;;  %v795_v50 = vsub.f32 %v763_v6, %v779_v47  ;;  %v291_v15 = vpop.f32.mrf.mxu0 }
 0x102   :  { %1461 = vpow2.f32 %v845_v59  ;;  %v843_v18 = vmul.f32 1.442695, %v827_v0  ;;  %v830_v19 = vmul.f32 %v1797_v48, %v679_v2  ;;  %v678_v8 = vmax.f32 %v662_v4, 0.0  ;;  %v468_v20 = vpop.f32.mrf.mxu1 }
 0x103   :  { %1463 = vpow2.f32 %v1023_v9  ;;  %v1021_v22 = vmul.f32 1.442695, %v1005_v10  ;;  %v1008_v23 = vmul.f32 %v1799_v49, %v812_v14  ;;  %v811_v24 = vmax.f32 %v795_v50, 0.0  ;;  %v1379_v26 = vpop.f32.mrf.mxu0 }
 0x104   :  { %1465 = vpow2.f32 %v843_v18  ;;  %v849_v28 = vmul.f32 1.442695, %v830_v19  ;;  %v829_v29 = vmul.f32 %v1797_v48, %v678_v8  ;;  %v649_v30 = vmul.f32 2.0, %v1376_v52  ;;  %v1435_v6 = vpop.f32.mrf.mxu1 }
 0x105   :  { %1467 = vpow2.f32 %v1021_v22  ;;  %v1027_v31 = vmul.f32 1.442695, %v1008_v23  ;;  %v1007_v32 = vmul.f32 %v1799_v49, %v811_v24  ;;  %v782_v33 = vmul.f32 2.0, %v1432_v5  ;;  %v301_v41 = vpop.f32.mrf.mxu0  ;;  %v1883_v5 = vpop.permute.xlu1 %1074 }
 0x106   :  { %1469 = vpow2.f32 %v849_v28  ;;  %v847_v34 = vmul.f32 1.442695, %v829_v29  ;;  %v665_v35 = vsub.f32 %v1803_v51, %v649_v30  ;;  %v648_v36 = vmul.f32 2.0, %v291_v15  ;;  %v478_v45 = vpop.f32.mrf.mxu1 }
 0x107   :  { %v1876_v38 = vadd.f32 %v1808_v54, %v751_v46  ;;  %1471 = vpow2.f32 %v1027_v31  ;;  %v798_v39 = vsub.f32 %v1841_v12, %v782_v33  ;;  %v781_v40 = vmul.f32 2.0, %v468_v20 }
 0x108   :  { %1473 = vpow2.f32 %v847_v34  ;;  %v681_v42 = vmax.f32 %v665_v35, 0.0  ;;  %v664_v43 = vsub.f32 %v1805_v53, %v648_v36  ;;  %v651_v44 = vmul.f32 2.0, %v1379_v26  ;;  %v1382_v26 = vpop.f32.mrf.mxu0 }
 0x109   :  { %v1025_v47 = vmul.f32 1.442695, %v1007_v32  ;;  %v814_v52 = vmax.f32 %v798_v39, 0.0  ;;  %v797_v59 = vsub.f32 %v1834_v7, %v781_v40  ;;  %v784_v51 = vmul.f32 2.0, %v1435_v6  ;;  %v755_v32 = vpop.permute.xlu1 %754 }
 0x10a   :  { %v832_v0 = vmul.f32 %v1797_v48, %v681_v42  ;;  %v680_v2 = vmax.f32 %v664_v43, 0.0  ;;  %v667_v4 = vsub.f32 %v1810_v55, %v651_v44  ;;  %v650_v12 = vmul.f32 2.0, %v301_v41  ;;  %v1438_v42 = vpop.f32.mrf.mxu1  ;;  %v311_v43 = vpop.f32.mrf.mxu0 }
 0x10b   :  { %v1010_v9 = vmul.f32 %v1799_v49, %v814_v52  ;;  %v813_v10 = vmax.f32 %v797_v59, 0.0  ;;  %v800_v53 = vsub.f32 %v1844_v13, %v784_v51  ;;  %v783_v14 = vmul.f32 2.0, %v478_v45 }
 0x10c   :  { %v853_v50 = vmul.f32 1.442695, %v832_v0  ;;  %v831_v15 = vmul.f32 %v1797_v48, %v680_v2  ;;  %v683_v18 = vmax.f32 %v667_v4, 0.0  ;;  %v666_v7 = vsub.f32 %v1814_v57, %v650_v12 }
 0x10d   :  { %v1031_v19 = vmul.f32 1.442695, %v1010_v9  ;;  %v1009_v8 = vmul.f32 %v1799_v49, %v813_v10  ;;  %v816_v20 = vmax.f32 %v800_v53, 0.0  ;;  %v799_v55 = vsub.f32 %v1838_v11, %v783_v14 }
 0x10e   :  { %1475 = vpow2.f32 %v1025_v47  ;;  %v851_v22 = vmul.f32 1.442695, %v831_v15  ;;  %v834_v23 = vmul.f32 %v1797_v48, %v683_v18  ;;  %v682_v24 = vmax.f32 %v666_v7, 0.0 }
 0x10f   :  { %v1462_v13 = vpop.eup %1461  ;;  %1477 = vpow2.f32 %v853_v50  ;;  %v1029_v46 = vmul.f32 1.442695, %v1009_v8  ;;  %v1012_v28 = vmul.f32 %v1799_v49, %v816_v20  ;;  %v815_v29 = vmax.f32 %v799_v55, 0.0  ;;  %v488_v8 = vpop.f32.mrf.mxu1 }
 0x110   :  { %v1464_v30 = vpop.eup %1463  ;;  %1479 = vpow2.f32 %v851_v22  ;;  %v857_v57 = vmul.f32 1.442695, %v834_v23  ;;  %v876_v6 = vmul.f32 %v1462_v13, %v1462_v13  ;;  %v833_v31 = vmul.f32 %v1797_v48, %v682_v24 }
 0x111   :  { %v1466_v11 = vpop.eup %1465  ;;  %1481 = vpow2.f32 %v1031_v19  ;;  %v1011_v33 = vmul.f32 %v1799_v49, %v815_v29  ;;  %v653_v34 = vmul.f32 2.0, %v1382_v26  ;;  %v1896_v35 = vadd.f32 %v1808_v54, %v755_v32 }
 0x112   :  { %v1468_v36 = vpop.eup %1467  ;;  %1483 = vpow2.f32 %v1029_v46  ;;  %v875_v39 = vmul.f32 %v1466_v11, %v1466_v11  ;;  %v892_v40 = vadd.f32 %v1462_v13, %v876_v6  ;;  %v908_v41 = vmul.f32 %v876_v6, %v876_v6 }
 0x113   :  { %v1898_v44 = vpop.eup %1469  ;;  %1485 = vpow2.f32 %v857_v57  ;;  %v1035_v45 = vmul.f32 1.442695, %v1012_v28  ;;  %v855_v47 = vmul.f32 1.442695, %v833_v31  ;;  %v669_v52 = vsub.f32 %v1812_v56, %v653_v34  ;;  %v1385_v31 = vpop.f32.mrf.mxu0 }
 0x114   :  { %v1901_v59 = vpop.eup %1471  ;;  %v891_v51 = vadd.f32 %v1466_v11, %v875_v39  ;;  %v907_v0 = vmul.f32 %v875_v39, %v875_v39  ;;  %v924_v54 = vadd.f32 %v908_v41, %v892_v40  ;;  %v940_v2 = vmul.f32 %v908_v41, %v908_v41  ;;  %v1071_v40 = vpop.permute.xlu0 %1070 }
 0x115   :  { %v1474_v4 = vpop.eup %1473  ;;  %v1033_v12 = vmul.f32 1.442695, %v1011_v33  ;;  %v685_v9 = vmax.f32 %v669_v52, 0.0  ;;  %v786_v10 = vmul.f32 2.0, %v1438_v42  ;;  %v652_v53 = vmul.f32 2.0, %v311_v43 }
 0x116   :  { %v923_v14 = vadd.f32 %v907_v0, %v891_v51  ;;  %v939_v50 = vmul.f32 %v907_v0, %v907_v0  ;;  %v956_v15 = vadd.f32 %v940_v2, %v924_v54  ;;  %v972_v18 = vmul.f32 %v940_v2, %v940_v2  ;;  %v1441_v51 = vpop.f32.mrf.mxu1 }
 0x117   :  { %1487 = vpow2.f32 %v855_v47  ;;  %v877_v7 = vmul.f32 %v1474_v4, %v1474_v4  ;;  %v836_v19 = vmul.f32 %v1797_v48, %v685_v9  ;;  %v802_v56 = vsub.f32 %v1850_v17, %v786_v10 }
 0x118   :  { %v955_v20 = vadd.f32 %v939_v50, %v923_v14  ;;  %v971_v55 = vmul.f32 %v939_v50, %v939_v50  ;;  %v988_v22 = vadd.f32 %v972_v18, %v956_v15  ;;  %v668_v23 = vsub.f32 %v1816_v58, %v652_v53  ;;  %v1910_v58 = vld [vmem:[%s1792_s10 + $0x2] ss:$0 sm:$0xff] }
 0x119   :  { %v893_v24 = vadd.f32 %v1474_v4, %v877_v7  ;;  %v909_v26 = vmul.f32 %v877_v7, %v877_v7  ;;  %v861_v13 = vmul.f32 1.442695, %v836_v19  ;;  %v818_v46 = vmax.f32 %v802_v56, 0.0 }
 0x11a   :  { %v987_v28 = vadd.f32 %v971_v55, %v955_v20  ;;  %v1054_v29 = vmul.f32 %v1464_v30, %v988_v22  ;;  %v684_v57 = vmax.f32 %v668_v23, 0.0  ;;  %v785_v6 = vmul.f32 2.0, %v488_v8  ;;  %v1079_v8 = vpop.permute.xlu0 %1078  ;;  %v321_v22 = vpop.f32.mrf.mxu0 }
 0x11b   :  { %v1476_v32 = vpop.eup %1475  ;;  %1489 = vpow2.f32 %v1035_v45  ;;  %v925_v11 = vadd.f32 %v909_v26, %v893_v24  ;;  %v941_v17 = vmul.f32 %v909_v26, %v909_v26  ;;  %v1014_v33 = vmul.f32 %v1799_v49, %v818_v46  ;;  %v498_v46 = vpop.f32.mrf.mxu1 }
 0x11c   :  { %v1907_v34 = vpop.eup %1477  ;;  %v1053_v39 = vmul.f32 %v1468_v36, %v987_v28  ;;  %v1134_v41 = vmul.f32 %v1883_v5, %v1054_v29  ;;  %v835_v42 = vmul.f32 %v1797_v48, %v684_v57  ;;  %v801_v30 = vsub.f32 %v1847_v16, %v785_v6 }
 0x11d   :  { %v1480_v43 = vpop.eup %1479  ;;  %1491 = vpow2.f32 %v1033_v12  ;;  %v957_v47 = vadd.f32 %v941_v17, %v925_v11  ;;  %v973_v45 = vmul.f32 %v941_v17, %v941_v17  ;;  %v655_v52 = vmul.f32 2.0, %v1385_v31 }
 0x11e   :  { %v1915_v0 = vpop.eup %1481  ;;  %v1133_v54 = vmul.f32 %v1071_v40, %v1053_v39  ;;  %1493 = vpow2.f32 %v861_v13  ;;  %v1039_v36 = vmul.f32 1.442695, %v1014_v33  ;;  %v817_v2 = vmax.f32 %v801_v30, 0.0 }
 0x11f   :  { %v1484_v4 = vpop.eup %1483  ;;  %v1155_v9 = vmul.f32 %v1910_v58, %v1134_v41  ;;  %v989_v5 = vadd.f32 %v973_v45, %v957_v47  ;;  %v879_v10 = vmul.f32 %v1480_v43, %v1480_v43  ;;  %v671_v53 = vsub.f32 %v1818_v60, %v655_v52  ;;  %v1388_v41 = vpop.f32.mrf.mxu0 }
 0x120   :  { %v1919_v16 = vpop.eup %1485  ;;  %v1154_v12 = vmul.f32 %v1910_v58, %v1133_v54  ;;  %v859_v14 = vmul.f32 1.442695, %v835_v42  ;;  %v1013_v50 = vmul.f32 %v1799_v49, %v817_v2  ;;  %v788_v15 = vmul.f32 2.0, %v1441_v51  ;;  %v1444_v47 = vpop.f32.mrf.mxu1 }
 0x121   :  { %v1055_v18 = vmul.f32 %v1476_v32, %v989_v5  ;;  %v895_v7 = vadd.f32 %v1480_v43, %v879_v10  ;;  %v911_v19 = vmul.f32 %v879_v10, %v879_v10  ;;  %v687_v56 = vmax.f32 %v671_v53, 0.0  ;;  %v1087_v53 = vpop.permute.xlu0 %1086 }
 0x122   :  { %1495 = vpow2.f32 %v1039_v36  ;;  %v1037_v20 = vmul.f32 1.442695, %v1013_v50  ;;  %v804_v55 = vsub.f32 %v1856_v25, %v788_v15  ;;  %v878_v60 = vmul.f32 %v1898_v44, %v1898_v44 }
 0x123   :  { %v1135_v23 = vmul.f32 %v1079_v8, %v1055_v18  ;;  %v927_v24 = vadd.f32 %v911_v19, %v895_v7  ;;  %v943_v26 = vmul.f32 %v911_v19, %v911_v19  ;;  %v838_v13 = vmul.f32 %v1797_v48, %v687_v56 }
 0x124   :  { %v1488_v28 = vpop.eup %1487  ;;  %1497 = vpow2.f32 %v859_v14  ;;  %v820_v29 = vmax.f32 %v804_v55, 0.0  ;;  %v894_v57 = vadd.f32 %v1898_v44, %v878_v60  ;;  %v910_v6 = vmul.f32 %v878_v60, %v878_v60  ;;  %v1083_v55 = vpop.permute.xlu1 %1082 }
 0x125   :  { %v1170_v31 = vadd.f32 %v1155_v9, %v1154_v12  ;;  %v1156_v32 = vmul.f32 %v1910_v58, %v1135_v23  ;;  %v959_v25 = vadd.f32 %v943_v26, %v927_v24  ;;  %v975_v11 = vmul.f32 %v943_v26, %v943_v26 }
 0x126   :  { %v865_v17 = vmul.f32 1.442695, %v838_v13  ;;  %v926_v33 = vadd.f32 %v910_v6, %v894_v57  ;;  %v942_v39 = vmul.f32 %v910_v6, %v910_v6  ;;  %v654_v40 = vmul.f32 2.0, %v321_v22 }
 0x127   :  { %1499 = vpow2.f32 %v1037_v20  ;;  %v991_v42 = vadd.f32 %v975_v11, %v959_v25  ;;  %v1016_v30 = vmul.f32 %v1799_v49, %v820_v29  ;;  %v787_v43 = vmul.f32 2.0, %v498_v46  ;;  %v508_v11 = vpop.f32.mrf.mxu1 }
 0x128   :  { %v1930_v45 = vpop.eup %1489  ;;  %v1171_v44 = vadd.f32 %v1170_v31, %v1156_v32  ;;  %v958_v52 = vadd.f32 %v942_v39, %v926_v33  ;;  %v974_v51 = vmul.f32 %v942_v39, %v942_v39  ;;  %v670_v54 = vsub.f32 %v1822_v62, %v654_v40 }
 0x129   :  { %v1057_v36 = vmul.f32 %v1484_v4, %v991_v42  ;;  %v803_v2 = vsub.f32 %v1853_v21, %v787_v43  ;;  %v881_v9 = vmul.f32 %v1488_v28, %v1488_v28  ;;  %v657_v5 = vmul.f32 2.0, %v1388_v41 }
 0x12a   :  { %v1492_v10 = vpop.eup %1491  ;;  %1501 = vpow2.f32 %v865_v17  ;;  %v990_v12 = vadd.f32 %v974_v51, %v958_v52  ;;  %v686_v14 = vmax.f32 %v670_v54, 0.0  ;;  %v790_v50 = vmul.f32 2.0, %v1444_v47 }
 0x12b   :  { %v1934_v15 = vpop.eup %1493  ;;  %v1137_v18 = vmul.f32 %v1087_v53, %v1057_v36  ;;  %v819_v7 = vmax.f32 %v803_v2, 0.0  ;;  %v897_v19 = vadd.f32 %v1488_v28, %v881_v9  ;;  %v913_v56 = vmul.f32 %v881_v9, %v881_v9 }
 0x12c   :  { %v1056_v8 = vmul.f32 %v1901_v59, %v990_v12  ;;  %v837_v62 = vmul.f32 %v1797_v48, %v686_v14  ;;  %v673_v21 = vsub.f32 %v1820_v61, %v657_v5  ;;  %v806_v4 = vsub.f32 %v1862_v37, %v790_v50  ;;  %v331_v37 = vpop.f32.mrf.mxu0  ;;  %v1095_v14 = vpop.permute.xlu0 %1094 }
 0x12d   :  { %v1043_v20 = vmul.f32 1.442695, %v1016_v30  ;;  %v1015_v60 = vmul.f32 %v1799_v49, %v819_v7  ;;  %v929_v22 = vadd.f32 %v913_v56, %v897_v19  ;;  %v945_v23 = vmul.f32 %v913_v56, %v913_v56  ;;  %v1447_v7 = vpop.f32.mrf.mxu1 }
 0x12e   :  { %v1136_v24 = vmul.f32 %v1083_v55, %v1056_v8  ;;  %v863_v26 = vmul.f32 1.442695, %v837_v62  ;;  %v689_v13 = vmax.f32 %v673_v21, 0.0  ;;  %v822_v46 = vmax.f32 %v806_v4, 0.0  ;;  %v1391_v5 = vpop.f32.mrf.mxu0 }
 0x12f   :  { %v1941_v28 = vpop.eup %1495  ;;  %v1158_v59 = vmul.f32 %v1910_v58, %v1137_v18  ;;  %v961_v29 = vadd.f32 %v945_v23, %v929_v22  ;;  %v977_v57 = vmul.f32 %v945_v23, %v945_v23  ;;  %v880_v61 = vmul.f32 %v1907_v34, %v1907_v34 }
 0x130   :  { %v1157_v6 = vmul.f32 %v1910_v58, %v1136_v24  ;;  %v1041_v31 = vmul.f32 1.442695, %v1015_v60  ;;  %v840_v32 = vmul.f32 %v1797_v48, %v689_v13  ;;  %v1018_v25 = vmul.f32 %v1799_v49, %v822_v46  ;;  %v1091_v24 = vpop.permute.xlu1 %1090 }
 0x131   :  { %v1498_v17 = vpop.eup %1497  ;;  %1503 = vpow2.f32 %v863_v26  ;;  %v993_v33 = vadd.f32 %v977_v57, %v961_v29  ;;  %v896_v39 = vadd.f32 %v1907_v34, %v880_v61  ;;  %v912_v40 = vmul.f32 %v880_v61, %v880_v61  ;;  %v341_v29 = vpop.f32.mrf.mxu0 }
 0x132   :  { %1505 = vpow2.f32 %v1043_v20  ;;  %v1172_v41 = vadd.f32 %v1171_v44, %v1157_v6  ;;  %v869_v42 = vmul.f32 1.442695, %v840_v32  ;;  %v656_v30 = vmul.f32 2.0, %v331_v37 }
 0x133   :  { %v1059_v43 = vmul.f32 %v1492_v10, %v993_v33  ;;  %v928_v47 = vadd.f32 %v912_v40, %v896_v39  ;;  %v944_v52 = vmul.f32 %v912_v40, %v912_v40  ;;  %v789_v51 = vmul.f32 2.0, %v508_v11  ;;  %v518_v11 = vpop.f32.mrf.mxu1 }
 0x134   :  { %v1500_v54 = vpop.eup %1499  ;;  %1507 = vpow2.f32 %v1041_v31  ;;  %v1047_v36 = vmul.f32 1.442695, %v1018_v25  ;;  %v672_v2 = vsub.f32 %v1824_v63, %v656_v30  ;;  %v883_v9 = vmul.f32 %v1498_v17, %v1498_v17 }
 0x135   :  { %1509 = vpow2.f32 %v869_v42  ;;  %v960_v53 = vadd.f32 %v944_v52, %v928_v47  ;;  %v976_v12 = vmul.f32 %v944_v52, %v944_v52  ;;  %v1173_v34 = vadd.f32 %v1172_v41, %v1158_v59 }
 0x136   :  { %v688_v50 = vmax.f32 %v672_v2, 0.0  ;;  %v805_v44 = vsub.f32 %v1859_v27, %v789_v51  ;;  %v899_v18 = vadd.f32 %v1498_v17, %v883_v9  ;;  %v915_v10 = vmul.f32 %v883_v9, %v883_v9  ;;  %v1103_v9 = vpop.permute.xlu0 %1102 }
 0x137   :  { %v1952_v19 = vpop.eup %1501  ;;  %v1139_v56 = vmul.f32 %v1095_v14, %v1059_v43  ;;  %v992_v8 = vadd.f32 %v976_v12, %v960_v53  ;;  %v659_v62 = vmul.f32 2.0, %v1391_v5  ;;  %v792_v21 = vmul.f32 2.0, %v1447_v7 }
 0x138   :  { %v839_v63 = vmul.f32 %v1797_v48, %v688_v50  ;;  %v821_v4 = vmax.f32 %v805_v44, 0.0  ;;  %v931_v20 = vadd.f32 %v915_v10, %v899_v18  ;;  %v947_v55 = vmul.f32 %v915_v10, %v915_v10 }
 0x139   :  { %v1058_v60 = vmul.f32 %v1915_v0, %v992_v8  ;;  %v675_v22 = vsub.f32 %v1826_v1, %v659_v62  ;;  %v808_v27 = vsub.f32 %v1896_v35, %v792_v21  ;;  %v882_v23 = vmul.f32 %v1919_v16, %v1919_v16  ;;  %v1099_v21 = vpop.permute.xlu1 %1098 }
 0x13a   :  { %v867_v26 = vmul.f32 1.442695, %v839_v63  ;;  %v1017_v13 = vmul.f32 %v1799_v49, %v821_v4  ;;  %v963_v46 = vadd.f32 %v947_v55, %v931_v20  ;;  %v979_v59 = vmul.f32 %v947_v55, %v947_v55 }
 0x13b   :  { %v1138_v57 = vmul.f32 %v1091_v24, %v1058_v60  ;;  %v691_v61 = vmax.f32 %v675_v22, 0.0  ;;  %v824_v37 = vmax.f32 %v808_v27, 0.0  ;;  %v898_v6 = vadd.f32 %v1919_v16, %v882_v23 }
 0x13c   :  { %1511 = vpow2.f32 %v867_v26  ;;  %v1045_v0 = vmul.f32 1.442695, %v1017_v13  ;;  %v995_v1 = vadd.f32 %v979_v59, %v963_v46  ;;  %v914_v31 = vmul.f32 %v882_v23, %v882_v23 }
 0x13d   :  { %1513 = vpow2.f32 %v1047_v36  ;;  %v1159_v35 = vmul.f32 %v1910_v58, %v1138_v57  ;;  %v842_v32 = vmul.f32 %v1797_v48, %v691_v61  ;;  %v658_v25 = vmul.f32 2.0, %v341_v29 }
 0x13e   :  { %v1504_v17 = vpop.eup %1503  ;;  %v1061_v33 = vmul.f32 %v1500_v54, %v995_v1  ;;  %v1020_v39 = vmul.f32 %v1799_v49, %v824_v37  ;;  %v930_v40 = vadd.f32 %v914_v31, %v898_v6  ;;  %v946_v41 = vmul.f32 %v914_v31, %v914_v31 }
 0x13f   :  { %v1965_v42 = vpop.eup %1505  ;;  %v1160_v16 = vmul.f32 %v1910_v58, %v1139_v56  ;;  %1515 = vpow2.f32 %v1045_v0  ;;  %v873_v30 = vmul.f32 1.442695, %v842_v32  ;;  %v674_v43 = vsub.f32 %v1829_v3, %v658_v25 }
 0x140   :  { %v1174_v47 = vadd.f32 %v1173_v34, %v1159_v35  ;;  %v962_v52 = vadd.f32 %v946_v41, %v930_v40  ;;  %v978_v51 = vmul.f32 %v946_v41, %v946_v41  ;;  %v791_v36 = vmul.f32 2.0, %v518_v11  ;;  %v1107_v35 = vpop.permute.xlu1 %1106 }
 0x141   :  { %v1508_v2 = vpop.eup %1507  ;;  %1517 = vpow2.f32 %v873_v30  ;;  %v690_v54 = vmax.f32 %v674_v43, 0.0  ;;  %v885_v5 = vmul.f32 %v1504_v17, %v1504_v17  ;;  %v1141_v12 = vmul.f32 %v1103_v9, %v1061_v33  ;;  %v1111_v33 = vpop.permute.xlu0 %1110 }
 0x142   :  { %v1510_v53 = vpop.eup %1509  ;;  %v1051_v14 = vmul.f32 1.442695, %v1020_v39  ;;  %v994_v50 = vadd.f32 %v978_v51, %v962_v52  ;;  %v807_v44 = vsub.f32 %v1876_v38, %v791_v36  ;;  %v884_v3 = vmul.f32 %v1934_v15, %v1934_v15 }
 0x143   :  { %v841_v18 = vmul.f32 %v1797_v48, %v690_v54  ;;  %v901_v10 = vadd.f32 %v1504_v17, %v885_v5  ;;  %v917_v7 = vmul.f32 %v885_v5, %v885_v5  ;;  %v1175_v56 = vadd.f32 %v1174_v47, %v1160_v16 }
 0x144   :  { %v1060_v34 = vmul.f32 %v1930_v45, %v994_v50  ;;  %v823_v8 = vmax.f32 %v807_v44, 0.0  ;;  %v886_v62 = vmul.f32 %v1952_v19, %v1952_v19  ;;  %v900_v38 = vadd.f32 %v1934_v15, %v884_v3 }
 0x145   :  { %v871_v63 = vmul.f32 1.442695, %v841_v18  ;;  %v933_v4 = vadd.f32 %v917_v7, %v901_v10  ;;  %v949_v20 = vmul.f32 %v917_v7, %v917_v7  ;;  %v916_v48 = vmul.f32 %v884_v3, %v884_v3  ;;  %v1115_v7 = vpop.permute.xlu1 %1114 }
 0x146   :  { %v1140_v55 = vmul.f32 %v1099_v21, %v1060_v34  ;;  %v902_v60 = vadd.f32 %v1952_v19, %v886_v62  ;;  %v888_v22 = vmul.f32 %v1510_v53, %v1510_v53  ;;  %v918_v45 = vmul.f32 %v886_v62, %v886_v62 }
 0x147   :  { %1519 = vpow2.f32 %v871_v63  ;;  %v965_v27 = vadd.f32 %v949_v20, %v933_v4  ;;  %v981_v23 = vmul.f32 %v949_v20, %v949_v20  ;;  %v1019_v26 = vmul.f32 %v1799_v49, %v823_v8 }
 0x148   :  { %v1161_v24 = vmul.f32 %v1910_v58, %v1140_v55  ;;  %v932_v13 = vadd.f32 %v916_v48, %v900_v38  ;;  %v948_v46 = vmul.f32 %v916_v48, %v916_v48  ;;  %v1162_v29 = vmul.f32 %v1910_v58, %v1141_v12  ;;  %v1119_v55 = vpop.permute.xlu0 %1118 }
 0x149   :  { %v1512_v59 = vpop.eup %1511  ;;  %v997_v57 = vadd.f32 %v981_v23, %v965_v27  ;;  %v934_v15 = vadd.f32 %v918_v45, %v902_v60  ;;  %v950_v61 = vmul.f32 %v918_v45, %v918_v45  ;;  %v904_v1 = vadd.f32 %v1510_v53, %v888_v22 }
 0x14a   :  { %v1514_v37 = vpop.eup %1513  ;;  %v1176_v6 = vadd.f32 %v1175_v56, %v1161_v24  ;;  %v964_v19 = vadd.f32 %v948_v46, %v932_v13  ;;  %v980_v0 = vmul.f32 %v948_v46, %v948_v46  ;;  %v887_v32 = vmul.f32 %v1512_v59, %v1512_v59 }
 0x14b   :  { %v1063_v31 = vmul.f32 %v1508_v2, %v997_v57  ;;  %v966_v25 = vadd.f32 %v950_v61, %v934_v15  ;;  %v982_v11 = vmul.f32 %v950_v61, %v950_v61  ;;  %1521 = vpow2.f32 %v1051_v14  ;;  %v1123_v61 = vpop.permute.xlu1 %1122 }
 0x14c   :  { %v1516_v17 = vpop.eup %1515  ;;  %v1049_v49 = vmul.f32 1.442695, %v1019_v26  ;;  %v996_v39 = vadd.f32 %v980_v0, %v964_v19  ;;  %v920_v40 = vmul.f32 %v888_v22, %v888_v22  ;;  %v903_v16 = vadd.f32 %v1512_v59, %v887_v32 }
 0x14d   :  { %v1143_v41 = vmul.f32 %v1111_v33, %v1063_v31  ;;  %v919_v30 = vmul.f32 %v887_v32, %v887_v32  ;;  %v998_v43 = vadd.f32 %v982_v11, %v966_v25  ;;  %v1177_v2 = vadd.f32 %v1176_v6, %v1162_v29 }
 0x14e   :  { %v1518_v47 = vpop.eup %1517  ;;  %v1062_v52 = vmul.f32 %v1941_v28, %v996_v39  ;;  %v936_v51 = vadd.f32 %v920_v40, %v904_v1  ;;  %v952_v36 = vmul.f32 %v920_v40, %v920_v40  ;;  %1523 = vpow2.f32 %v1049_v49 }
 0x14f   :  { %v935_v9 = vadd.f32 %v919_v30, %v903_v16  ;;  %v951_v54 = vmul.f32 %v919_v30, %v919_v30  ;;  %v1064_v5 = vmul.f32 %v1965_v42, %v998_v43  ;;  %v890_v50 = vmul.f32 %v1518_v47, %v1518_v47 }
 0x150   :  { %v1142_v53 = vmul.f32 %v1107_v35, %v1062_v52  ;;  %v968_v12 = vadd.f32 %v952_v36, %v936_v51  ;;  %v984_v14 = vmul.f32 %v952_v36, %v952_v36  ;;  %v1164_v44 = vmul.f32 %v1910_v58, %v1143_v41 }
 0x151   :  { %v967_v18 = vadd.f32 %v951_v54, %v935_v9  ;;  %v983_v10 = vmul.f32 %v951_v54, %v951_v54  ;;  %v1144_v28 = vmul.f32 %v1115_v7, %v1064_v5  ;;  %v906_v34 = vadd.f32 %v1518_v47, %v890_v50 }
 0x152   :  { %v1163_v3 = vmul.f32 %v1910_v58, %v1142_v53  ;;  %v922_v56 = vmul.f32 %v890_v50, %v890_v50  ;;  %v1000_v62 = vadd.f32 %v984_v14, %v968_v12 }
 0x153   :  { %v999_v8 = vadd.f32 %v983_v10, %v967_v18  ;;  %v1165_v48 = vmul.f32 %v1910_v58, %v1144_v28 }
 0x154   :  { %v1520_v21 = vpop.eup %1519  ;;  %v1178_v63 = vadd.f32 %v1177_v2, %v1163_v3  ;;  %v938_v42 = vadd.f32 %v922_v56, %v906_v34  ;;  %v954_v4 = vmul.f32 %v922_v56, %v922_v56  ;;  %v1066_v26 = vmul.f32 %v1514_v37, %v1000_v62  ;;  %v1131_v37 = vpop.permute.xlu1 %1130 }
 0x155   :  { %v1065_v20 = vmul.f32 %v1516_v17, %v999_v8  ;;  %v889_v38 = vmul.f32 %v1520_v21, %v1520_v21  ;;  %v1127_v17 = vpop.permute.xlu0 %1126 }
 0x156   :  { %v1179_v60 = vadd.f32 %v1178_v63, %v1164_v44  ;;  %v970_v22 = vadd.f32 %v954_v4, %v938_v42  ;;  %v986_v27 = vmul.f32 %v954_v4, %v954_v4  ;;  %v1146_v0 = vmul.f32 %v1123_v61, %v1066_v26 }
 0x157   :  { %v1145_v23 = vmul.f32 %v1119_v55, %v1065_v20  ;;  %v905_v45 = vadd.f32 %v1520_v21, %v889_v38  ;;  %v921_v24 = vmul.f32 %v889_v38, %v889_v38 }
 0x158   :  { %v1180_v13 = vadd.f32 %v1179_v60, %v1165_v48  ;;  %v1522_v46 = vpop.eup %1521  ;;  %v1002_v15 = vadd.f32 %v986_v27, %v970_v22  ;;  %v1167_v11 = vmul.f32 %v1910_v58, %v1146_v0 }
 0x159   :  { %v1166_v59 = vmul.f32 %v1910_v58, %v1145_v23  ;;  %v937_v29 = vadd.f32 %v921_v24, %v905_v45  ;;  %v953_v57 = vmul.f32 %v921_v24, %v921_v24 }
 0x15a   :  { %v1068_v35 = vmul.f32 %v1522_v46, %v1002_v15 }
 0x15b   :  { %v969_v6 = vadd.f32 %v953_v57, %v937_v29  ;;  %v985_v19 = vmul.f32 %v953_v57, %v953_v57  ;;  %v1181_v31 = vadd.f32 %v1180_v13, %v1166_v59  ;;  %v1524_v32 = vpop.eup %1523 }
 0x15c   :  { %v1148_v39 = vmul.f32 %v1131_v37, %v1068_v35 }
 0x15d   :  { %v1001_v1 = vadd.f32 %v985_v19, %v969_v6  ;;  %v1182_v33 = vadd.f32 %v1181_v31, %v1167_v11 }
 0x15e   :  { %v1169_v41 = vmul.f32 %v1910_v58, %v1148_v39 }
 0x15f   :  { %v1067_v25 = vmul.f32 %v1524_v32, %v1001_v1 }
 0x161   :  { %v1147_v49 = vmul.f32 %v1127_v17, %v1067_v25 }
 0x163   :  { %v1168_v40 = vmul.f32 %v1910_v58, %v1147_v49  ;;  %1190 = sbr.rel (%p1271_p9) target bundleno = 362 (0x16a), region = 37 }
 0x165   :  { %v1183_v16 = vadd.f32 %v1182_v33, %v1168_v40 }
 0x167   :  { %v1184_v30 = vadd.f32 %v1183_v16, %v1169_v41 }
 0x168   :  { %v1543_v43 = vmov 0.0  }
 0x169   :  { %1191 = vst [vmem:[%s1620_s30] sm:$0xff] %v1543_v43 }
 0x16a PF:  { %v1193_v52 = vstv %s1786_s24 }
 0x16b   :  { %v1194_v58 = vmul.f32 %v1193_v52, %v1184_v30 }
 0x170   :  { %v1192_v47 = vld [vmem:[%s1620_s30] sm:$0xff] }
 0x171   :  { %v1195_v51 = vadd.f32 %v1194_v58, %v1192_v47 }
 0x173   :  { %1196 = vst [vmem:[%s1620_s30] sm:$0xff] %v1195_v51 }
 0x174   :  { %1212 = vsyncpa [#allocation6], 1 }

</bundles_post_ra>
